<compile_context>
chip_gen: v6e
topology: v6e:2x2x1
jax: 0.10.0
libtpu: 0.0.40
codegen_flags: <defaults>
</compile_context>

<pallas_src>
import math

import jax
import jax.numpy as jnp
from jax.experimental import pallas as pl
from jax.experimental.pallas import tpu as pltpu


_VMEM_BUDGET = 40 * 1024 * 1024   # keep headroom under v7x's 64 MiB physical VMEM


def _round_up(a, m):
    return ((a + m - 1) // m) * m


def _ae_kernel(x_ref, w_enc_ref, b_enc_ref, w_dec_ref, b_dec_ref, z_ref, recon_ref):
    # Encoder: cast activations to bf16 at the MXU input (weights are already bf16),
    # accumulate in f32, add bias, ReLU (activation_fct).
    x = x_ref[...].astype(jnp.bfloat16)
    h = jnp.dot(x, w_enc_ref[...], preferred_element_type=jnp.float32)
    h = h + b_enc_ref[...]
    z = jnp.maximum(h, 0.0).astype(jnp.bfloat16)
    z_ref[...] = z.astype(z_ref.dtype)            # lane-dense (TB, L_pad) store

    # Decoder consumes the same bf16 latent that is stored (z/recon consistent).
    recon = jnp.dot(z, w_dec_ref[...], preferred_element_type=jnp.float32)
    recon = recon + b_dec_ref[...]
    recon_ref[...] = recon.astype(recon_ref.dtype)


def prepare_autoencoder_params(w_enc, b_enc, w_dec, b_dec):
    """Pad to lane multiples of 128 and cast -- do this ONCE at parameter-load time."""
    D, L = w_enc.shape
    assert w_dec.shape == (L, D)
    D_pad = _round_up(D, 128)
    L_pad = _round_up(L, 128)
    # Zero padding keeps the math exact: padded z columns are relu(0 + 0) = 0 and the
    # padded w_dec rows/columns are 0, so both contractions are numerically unchanged.
    w_enc_p = jnp.pad(w_enc, ((0, D_pad - D), (0, L_pad - L))).astype(jnp.bfloat16)
    b_enc_p = jnp.pad(b_enc.reshape(1, -1), ((0, 0), (0, L_pad - L))).astype(jnp.float32)
    w_dec_p = jnp.pad(w_dec, ((0, L_pad - L), (0, D_pad - D))).astype(jnp.bfloat16)
    b_dec_p = jnp.pad(b_dec.reshape(1, -1), ((0, 0), (0, D_pad - D))).astype(jnp.float32)
    return dict(w_enc=w_enc_p, b_enc=b_enc_p, w_dec=w_dec_p, b_dec=b_dec_p,
                D=D, L=L, D_pad=D_pad, L_pad=L_pad)


def _vmem_bytes(TB, D_pad, L_pad, weight_bufs):
    tb = _round_up(max(TB, 1), 8)                       # sublane padding
    est = 2 * tb * D_pad * 4                            # x f32, double-buffered
    est += 2 * tb * D_pad * 2                           # recon bf16, double-buffered
    est += 2 * tb * L_pad * 2                           # z bf16, double-buffered
    est += weight_bufs * 2 * D_pad * L_pad * 2          # w_enc + w_dec (bf16)
    est += weight_bufs * 8 * (D_pad + L_pad) * 4        # biases (f32, sublane-padded)
    return est


def _choose_tb(B, tile_b, D_pad, L_pad):
    """Pick the batch tile: VMEM-budgeted, divides B when possible, >=2 steps if B allows."""
    per_tb = 2 * D_pad * 4 + 2 * D_pad * 2 + 2 * L_pad * 2
    fixed = 2 * 2 * D_pad * L_pad * 2 + 2 * 8 * (D_pad + L_pad) * 4  # worst case: double-buffered weights
    # TODO(synk): for D large enough to bust this budget, add a D-tiled (column-chunked
    #             decoder + K-chunked encoder) kernel variant.
    assert fixed + 8 * per_tb <= _VMEM_BUDGET, (
        f"D_pad={D_pad} too large for the full-D block layout (needs a D-tiled kernel)")
    tb_cap = max(8, (min(tile_b, (_VMEM_BUDGET - fixed) // per_tb) // 8) * 8)

    if B % 8 != 0:
        if B <= tb_cap:
            return B, B                                  # full-batch block, no padding
        return tb_cap, _round_up(B, tb_cap)

    cap = min(tb_cap, B)
    if B >= 16:
        cap = min(cap, max(8, ((B // 2) // 8) * 8))      # >=2 grid steps (v7x megacore)
    for tb in range(cap, 7, -8):                         # prefer a divisor of B: no pad,
        if B % tb == 0:                                  # outputs need no [:B] slice copy
            if tb * 4 >= cap:
                return tb, B
            break
    return cap, _round_up(B, cap)


def autoencoder_forward(x_nchw, params, *, tile_b=512, out_dtype=jnp.bfloat16):
    """x_nchw: [B, C, H, W].  Returns (recon [B,C,H,W] out_dtype, z [B,L] bf16)."""
    B = x_nchw.shape[0]
    D, L = params["D"], params["L"]
    D_pad, L_pad = params["D_pad"], params["L_pad"]
    assert math.prod(x_nchw.shape[1:]) == D

    # Activations stay f32 here (cast happens in-kernel); padding below is a no-op for
    # lane-aligned D and for B handled by a full-batch / divisor tile.
    x = x_nchw.reshape(B, D)
    if x.dtype != jnp.float32:
        x = x.astype(jnp.float32)
    if D_pad != D:
        x = jnp.pad(x, ((0, 0), (0, D_pad - D)))

    TB, B_pad = _choose_tb(B, tile_b, D_pad, L_pad)
    if B_pad != B:
        x = jnp.pad(x, ((0, B_pad - B), (0, 0)))
    grid = (B_pad // TB,)

    cost = pl.CostEstimate(
        flops=int(4 * B_pad * D_pad * L_pad),            # two matmuls
        transcendentals=0,
        bytes_accessed=int(
            B_pad * D_pad * 4                            # x (f32 in)
            + 2 * D_pad * L_pad * 2                      # w_enc + w_dec (bf16)
            + (D_pad + L_pad) * 4                        # biases (f32)
            + B_pad * L_pad * 2 + B_pad * D_pad * 2),    # z + recon (bf16 out)
    )

    def call(single_buffer_weights):
        res = dict(pipeline_mode=pl.Buffered(1)) if single_buffer_weights else {}
        weight_bufs = 1 if single_buffer_weights else 2
        in_specs = [
            pl.BlockSpec((TB, D_pad), lambda i: (i, 0)),             # x: streamed tiles
            pl.BlockSpec((D_pad, L_pad), lambda i: (0, 0), **res),   # VMEM-resident weights
            pl.BlockSpec((1, L_pad), lambda i: (0, 0), **res),
            pl.BlockSpec((L_pad, D_pad), lambda i: (0, 0), **res),
            pl.BlockSpec((1, D_pad), lambda i: (0, 0), **res),
        ]
        out_specs = (
            pl.BlockSpec((TB, L_pad), lambda i: (i, 0)),
            pl.BlockSpec((TB, D_pad), lambda i: (i, 0)),
        )
        vmem_limit = min(
            64 * 1024 * 1024,
            max(16 * 1024 * 1024,
                int(1.5 * _vmem_bytes(TB, D_pad, L_pad, weight_bufs)) + (2 << 20)))
        return pl.pallas_call(
            _ae_kernel,
            out_shape=(
                jax.ShapeDtypeStruct((B_pad, L_pad), jnp.bfloat16),  # latent z
                jax.ShapeDtypeStruct((B_pad, D_pad), out_dtype),     # reconstruction
            ),
            grid=grid,
            in_specs=in_specs,
            out_specs=out_specs,
            compiler_params=pltpu.CompilerParams(
                dimension_semantics=("parallel",),                   # megacore over batch tiles
                vmem_limit_bytes=vmem_limit),
            cost_estimate=cost,
        )(x, params["w_enc"], params["b_enc"], params["w_dec"], params["b_dec"])

    try:
        z_pad, recon_pad = call(single_buffer_weights=True)
    except Exception:
        # pipeline_mode=pl.Buffered(1) not supported by this Pallas build -> fall back
        # to default double-buffered resident weights (costs a bit of extra VMEM only).
        z_pad, recon_pad = call(single_buffer_weights=False)

    z = z_pad[:B, :L]
    recon = recon_pad
    if B_pad != B or D_pad != D:
        recon = recon[:B, :D]
    recon = recon.reshape((B,) + tuple(x_nchw.shape[1:]))
    return recon, z


if __name__ == "__main__":
    # Small shapes consistent with the module:
    #   input_dimension = [C*H*W] -> flattened image dim (non-sVAE path)
    #   config.model.n_latent_nodes = 32
    B, C, H, W = 2, 4, 16, 16
    D = C * H * W          # input_dimension[0] = 1024
    L = 32                 # n_latent_nodes

    key = jax.random.PRNGKey(0)
    kx, k1, k2, k3, k4 = jax.random.split(key, 5)

    x = jax.random.normal(kx, (B, C, H, W), dtype=jnp.float32)
    # Deterministic synthetic parameters (no checkpoint load).
    w_enc = 0.02 * jax.random.normal(k1, (D, L), dtype=jnp.float32)
    b_enc = 0.01 * jax.random.normal(k2, (L,), dtype=jnp.float32)
    w_dec = 0.02 * jax.random.normal(k3, (L, D), dtype=jnp.float32)
    b_dec = 0.01 * jax.random.normal(k4, (D,), dtype=jnp.float32)

    params = prepare_autoencoder_params(w_enc, b_enc, w_dec, b_dec)  # once, at load time
    recon, z = autoencoder_forward(x, params)
    jax.block_until_ready((recon, z))

    # Plain-JAX reference with matching numerics (bf16 weights/activations, f32 acc,
    # the same bf16 latent feeding the decoder, bf16 outputs).
    xb = x.reshape(B, D).astype(jnp.bfloat16)
    z_ref = jnp.maximum(
        jnp.dot(xb, w_enc.astype(jnp.bfloat16), preferred_element_type=jnp.float32)
        + b_enc[None, :], 0.0).astype(jnp.bfloat16)
    recon_ref = (jnp.dot(z_ref, w_dec.astype(jnp.bfloat16),
                         preferred_element_type=jnp.float32)
                 + b_dec[None, :]).astype(jnp.bfloat16).reshape(B, C, H, W)

    assert z.shape == (B, L) and z.dtype == jnp.bfloat16
    assert recon.shape == (B, C, H, W) and recon.dtype == jnp.bfloat16
    assert jnp.allclose(z.astype(jnp.float32), z_ref.astype(jnp.float32),
                        atol=2e-2, rtol=2e-2)
    assert jnp.allclose(recon.astype(jnp.float32), recon_ref.astype(jnp.float32),
                        atol=2e-2, rtol=2e-2)

    print("KERNEL_OK")
</pallas_src>

<mosaic_0001>
module attributes {stable_mosaic.version = 11 : i64} {
  func.func @_ae_kernel(%arg0: i32, %arg1: memref<2x1024xf32, #tpu.memory_space<vmem>>, %arg2: memref<1024x128xbf16, #tpu.memory_space<vmem>>, %arg3: memref<1x128xf32, #tpu.memory_space<vmem>>, %arg4: memref<128x1024xbf16, #tpu.memory_space<vmem>>, %arg5: memref<1x1024xf32, #tpu.memory_space<vmem>>, %arg6: memref<2x128xbf16, #tpu.memory_space<vmem>>, %arg7: memref<2x1024xbf16, #tpu.memory_space<vmem>>) attributes {dimension_semantics = [#tpu.dimension_semantics<parallel>], iteration_bounds = array<i64: 1>, scalar_prefetch = 0 : i64, scratch_operands = 0 : i64, tpu.core_type = #tpu.core_type<tc>, window_params = [{transform_indices = @transform_0, window_bounds = array<i64: 2, 1024>}, {pipeline_mode = #tpu.pipeline_mode<synchronous>, transform_indices = @transform_1, window_bounds = array<i64: 1024, 128>}, {pipeline_mode = #tpu.pipeline_mode<synchronous>, transform_indices = @transform_2, window_bounds = array<i64: 1, 128>}, {pipeline_mode = #tpu.pipeline_mode<synchronous>, transform_indices = @transform_3, window_bounds = array<i64: 128, 1024>}, {pipeline_mode = #tpu.pipeline_mode<synchronous>, transform_indices = @transform_4, window_bounds = array<i64: 1, 1024>}, {transform_indices = @transform_5, window_bounds = array<i64: 2, 128>}, {transform_indices = @transform_6, window_bounds = array<i64: 2, 1024>}]} {
    %c0 = arith.constant 0 : index
    %c0_0 = arith.constant 0 : index
    %0 = vector.load %arg1[%c0, %c0_0] : memref<2x1024xf32, #tpu.memory_space<vmem>>, vector<2x1024xf32>
    %1 = arith.truncf %0 : vector<2x1024xf32> to vector<2x1024xbf16>
    %c0_1 = arith.constant 0 : index
    %c0_2 = arith.constant 0 : index
    %2 = vector.load %arg2[%c0_1, %c0_2] : memref<1024x128xbf16, #tpu.memory_space<vmem>>, vector<1024x128xbf16>
    %cst = arith.constant dense<0.000000e+00> : vector<2x128xf32>
    %3 = tpu.matmul %1, %2, %cst {dimension_numbers = #tpu.dot_dimension_numbers<[1], [0], [0], [1], [0, 0, 1, 1], [], []>} : vector<2x1024xbf16>, vector<1024x128xbf16>, vector<2x128xf32> -> vector<2x128xf32>
    %c0_3 = arith.constant 0 : index
    %c0_4 = arith.constant 0 : index
    %4 = vector.load %arg3[%c0_3, %c0_4] : memref<1x128xf32, #tpu.memory_space<vmem>>, vector<1x128xf32>
    %5 = vector.broadcast %4 : vector<1x128xf32> to vector<2x128xf32>
    %6 = arith.addf %3, %5 : vector<2x128xf32>
    %cst_5 = arith.constant 0.000000e+00 : f32
    %7 = vector.broadcast %cst_5 : f32 to vector<2x128xf32>
    %8 = arith.maximumf %6, %7 : vector<2x128xf32>
    %9 = arith.truncf %8 : vector<2x128xf32> to vector<2x128xbf16>
    %c0_6 = arith.constant 0 : index
    %c0_7 = arith.constant 0 : index
    %10 = vector.load %arg6[%c0_6, %c0_7] : memref<2x128xbf16, #tpu.memory_space<vmem>>, vector<2x128xbf16>
    tpu.vector_store %arg6[%c0_6, %c0_7], %9 {strides = array<i32>} : memref<2x128xbf16, #tpu.memory_space<vmem>>, vector<2x128xbf16>,
    %c0_8 = arith.constant 0 : index
    %c0_9 = arith.constant 0 : index
    %11 = vector.load %arg4[%c0_8, %c0_9] : memref<128x1024xbf16, #tpu.memory_space<vmem>>, vector<128x1024xbf16>
    %cst_10 = arith.constant dense<0.000000e+00> : vector<2x1024xf32>
    %12 = tpu.matmul %9, %11, %cst_10 {dimension_numbers = #tpu.dot_dimension_numbers<[1], [0], [0], [1], [0, 0, 1, 1], [], []>} : vector<2x128xbf16>, vector<128x1024xbf16>, vector<2x1024xf32> -> vector<2x1024xf32>
    %c0_11 = arith.constant 0 : index
    %c0_12 = arith.constant 0 : index
    %13 = vector.load %arg5[%c0_11, %c0_12] : memref<1x1024xf32, #tpu.memory_space<vmem>>, vector<1x1024xf32>
    %14 = vector.broadcast %13 : vector<1x1024xf32> to vector<2x1024xf32>
    %15 = arith.addf %12, %14 : vector<2x1024xf32>
    %16 = arith.truncf %15 : vector<2x1024xf32> to vector<2x1024xbf16>
    %c0_13 = arith.constant 0 : index
    %c0_14 = arith.constant 0 : index
    %17 = vector.load %arg7[%c0_13, %c0_14] : memref<2x1024xbf16, #tpu.memory_space<vmem>>, vector<2x1024xbf16>
    tpu.vector_store %arg7[%c0_13, %c0_14], %16 {strides = array<i32>} : memref<2x1024xbf16, #tpu.memory_space<vmem>>, vector<2x1024xbf16>,
    return
  }
  func.func @transform_0(%arg0: i32) -> (i32, i32) {
    %c0_i32 = arith.constant 0 : i32
    %c0_i32_0 = arith.constant 0 : i32
    return %arg0, %c0_i32 : i32, i32
  }
  func.func @transform_1(%arg0: i32) -> (i32, i32) {
    %c0_i32 = arith.constant 0 : i32
    %c0_i32_0 = arith.constant 0 : i32
    %c0_i32_1 = arith.constant 0 : i32
    return %c0_i32, %c0_i32_0 : i32, i32
  }
  func.func @transform_2(%arg0: i32) -> (i32, i32) {
    %c0_i32 = arith.constant 0 : i32
    %c0_i32_0 = arith.constant 0 : i32
    %c0_i32_1 = arith.constant 0 : i32
    return %c0_i32, %c0_i32_0 : i32, i32
  }
  func.func @transform_3(%arg0: i32) -> (i32, i32) {
    %c0_i32 = arith.constant 0 : i32
    %c0_i32_0 = arith.constant 0 : i32
    %c0_i32_1 = arith.constant 0 : i32
    return %c0_i32, %c0_i32_0 : i32, i32
  }
  func.func @transform_4(%arg0: i32) -> (i32, i32) {
    %c0_i32 = arith.constant 0 : i32
    %c0_i32_0 = arith.constant 0 : i32
    %c0_i32_1 = arith.constant 0 : i32
    return %c0_i32, %c0_i32_0 : i32, i32
  }
  func.func @transform_5(%arg0: i32) -> (i32, i32) {
    %c0_i32 = arith.constant 0 : i32
    %c0_i32_0 = arith.constant 0 : i32
    return %arg0, %c0_i32 : i32, i32
  }
  func.func @transform_6(%arg0: i32) -> (i32, i32) {
    %c0_i32 = arith.constant 0 : i32
    %c0_i32_0 = arith.constant 0 : i32
    return %arg0, %c0_i32 : i32, i32
  }
}

module attributes {stable_mosaic.version = 11 : i64} {
  func.func @_ae_kernel(%arg0: i32, %arg1: memref<2x1024xf32, #tpu.memory_space<vmem>>, %arg2: memref<1024x128xbf16, #tpu.memory_space<vmem>>, %arg3: memref<1x128xf32, #tpu.memory_space<vmem>>, %arg4: memref<128x1024xbf16, #tpu.memory_space<vmem>>, %arg5: memref<1x1024xf32, #tpu.memory_space<vmem>>, %arg6: memref<2x128xbf16, #tpu.memory_space<vmem>>, %arg7: memref<2x1024xbf16, #tpu.memory_space<vmem>>) attributes {dimension_semantics = [#tpu.dimension_semantics<parallel>], iteration_bounds = array<i64: 1>, scalar_prefetch = 0 : i64, scratch_operands = 0 : i64, tpu.core_type = #tpu.core_type<tc>, window_params = [{transform_indices = @transform_0, window_bounds = array<i64: 2, 1024>}, {pipeline_mode = #tpu.pipeline_mode<synchronous>, transform_indices = @transform_1, window_bounds = array<i64: 1024, 128>}, {pipeline_mode = #tpu.pipeline_mode<synchronous>, transform_indices = @transform_2, window_bounds = array<i64: 1, 128>}, {pipeline_mode = #tpu.pipeline_mode<synchronous>, transform_indices = @transform_3, window_bounds = array<i64: 128, 1024>}, {pipeline_mode = #tpu.pipeline_mode<synchronous>, transform_indices = @transform_4, window_bounds = array<i64: 1, 1024>}, {transform_indices = @transform_5, window_bounds = array<i64: 2, 128>}, {transform_indices = @transform_6, window_bounds = array<i64: 2, 1024>}]} {
    %c0 = arith.constant 0 : index
    %c0_0 = arith.constant 0 : index
    %0 = vector.load %arg1[%c0, %c0_0] : memref<2x1024xf32, #tpu.memory_space<vmem>>, vector<2x1024xf32>
    %1 = arith.truncf %0 : vector<2x1024xf32> to vector<2x1024xbf16>
    %c0_1 = arith.constant 0 : index
    %c0_2 = arith.constant 0 : index
    %2 = vector.load %arg2[%c0_1, %c0_2] : memref<1024x128xbf16, #tpu.memory_space<vmem>>, vector<1024x128xbf16>
    %cst = arith.constant dense<0.000000e+00> : vector<2x128xf32>
    %3 = tpu.matmul %1, %2, %cst {dimension_numbers = #tpu.dot_dimension_numbers<[1], [0], [0], [1], [0, 0, 1, 1], [], []>} : vector<2x1024xbf16>, vector<1024x128xbf16>, vector<2x128xf32> -> vector<2x128xf32>
    %c0_3 = arith.constant 0 : index
    %c0_4 = arith.constant 0 : index
    %4 = vector.load %arg3[%c0_3, %c0_4] : memref<1x128xf32, #tpu.memory_space<vmem>>, vector<1x128xf32>
    %5 = vector.broadcast %4 : vector<1x128xf32> to vector<2x128xf32>
    %6 = arith.addf %3, %5 : vector<2x128xf32>
    %cst_5 = arith.constant 0.000000e+00 : f32
    %7 = vector.broadcast %cst_5 : f32 to vector<2x128xf32>
    %8 = arith.maximumf %6, %7 : vector<2x128xf32>
    %9 = arith.truncf %8 : vector<2x128xf32> to vector<2x128xbf16>
    %c0_6 = arith.constant 0 : index
    %c0_7 = arith.constant 0 : index
    %10 = vector.load %arg6[%c0_6, %c0_7] : memref<2x128xbf16, #tpu.memory_space<vmem>>, vector<2x128xbf16>
    tpu.vector_store %arg6[%c0_6, %c0_7], %9 {strides = array<i32>} : memref<2x128xbf16, #tpu.memory_space<vmem>>, vector<2x128xbf16>,
    %c0_8 = arith.constant 0 : index
    %c0_9 = arith.constant 0 : index
    %11 = vector.load %arg4[%c0_8, %c0_9] : memref<128x1024xbf16, #tpu.memory_space<vmem>>, vector<128x1024xbf16>
    %cst_10 = arith.constant dense<0.000000e+00> : vector<2x1024xf32>
    %12 = tpu.matmul %9, %11, %cst_10 {dimension_numbers = #tpu.dot_dimension_numbers<[1], [0], [0], [1], [0, 0, 1, 1], [], []>} : vector<2x128xbf16>, vector<128x1024xbf16>, vector<2x1024xf32> -> vector<2x1024xf32>
    %c0_11 = arith.constant 0 : index
    %c0_12 = arith.constant 0 : index
    %13 = vector.load %arg5[%c0_11, %c0_12] : memref<1x1024xf32, #tpu.memory_space<vmem>>, vector<1x1024xf32>
    %14 = vector.broadcast %13 : vector<1x1024xf32> to vector<2x1024xf32>
    %15 = arith.addf %12, %14 : vector<2x1024xf32>
    %16 = arith.truncf %15 : vector<2x1024xf32> to vector<2x1024xbf16>
    %c0_13 = arith.constant 0 : index
    %c0_14 = arith.constant 0 : index
    %17 = vector.load %arg7[%c0_13, %c0_14] : memref<2x1024xbf16, #tpu.memory_space<vmem>>, vector<2x1024xbf16>
    tpu.vector_store %arg7[%c0_13, %c0_14], %16 {strides = array<i32>} : memref<2x1024xbf16, #tpu.memory_space<vmem>>, vector<2x1024xbf16>,
    return
  }
  func.func @transform_0(%arg0: i32) -> (i32, i32) {
    %c0_i32 = arith.constant 0 : i32
    %c0_i32_0 = arith.constant 0 : i32
    return %arg0, %c0_i32 : i32, i32
  }
  func.func @transform_1(%arg0: i32) -> (i32, i32) {
    %c0_i32 = arith.constant 0 : i32
    %c0_i32_0 = arith.constant 0 : i32
    %c0_i32_1 = arith.constant 0 : i32
    return %c0_i32, %c0_i32_0 : i32, i32
  }
  func.func @transform_2(%arg0: i32) -> (i32, i32) {
    %c0_i32 = arith.constant 0 : i32
    %c0_i32_0 = arith.constant 0 : i32
    %c0_i32_1 = arith.constant 0 : i32
    return %c0_i32, %c0_i32_0 : i32, i32
  }
  func.func @transform_3(%arg0: i32) -> (i32, i32) {
    %c0_i32 = arith.constant 0 : i32
    %c0_i32_0 = arith.constant 0 : i32
    %c0_i32_1 = arith.constant 0 : i32
    return %c0_i32, %c0_i32_0 : i32, i32
  }
  func.func @transform_4(%arg0: i32) -> (i32, i32) {
    %c0_i32 = arith.constant 0 : i32
    %c0_i32_0 = arith.constant 0 : i32
    %c0_i32_1 = arith.constant 0 : i32
    return %c0_i32, %c0_i32_0 : i32, i32
  }
  func.func @transform_5(%arg0: i32) -> (i32, i32) {
    %c0_i32 = arith.constant 0 : i32
    %c0_i32_0 = arith.constant 0 : i32
    return %arg0, %c0_i32 : i32, i32
  }
  func.func @transform_6(%arg0: i32) -> (i32, i32) {
    %c0_i32 = arith.constant 0 : i32
    %c0_i32_0 = arith.constant 0 : i32
    return %arg0, %c0_i32 : i32, i32
  }
}

</mosaic_0001>

<bundles_post_ra>
// kernel: tpu_custom_call.1
= control target key start
LH: loop header
LB: loop body
LE: loop exit
PB: predicated region body
PF: predicated region fallthrough
CT: control target
= control target key end

     0   :  { %12 = vsyncpa [#allocation3], 0  ;;  %s2024_s0 = inlined_call_operand.hbm [shape: f32[2,1024], index: 0, kind: input, shape index: {}]   ;;  %s2025_s1 = inlined_call_operand.hbm [shape: bf16[1024,128], index: 1, kind: input, shape index: {}]   ;;  %s2026_s2 = inlined_call_operand.vmem [shape: f32[1,128], index: 2, kind: input, shape index: {}]   ;;  %s2027_s3 = inlined_call_operand.hbm [shape: bf16[128,1024], index: 3, kind: input, shape index: {}]   ;;  %s2028_s4 = inlined_call_operand.hbm [shape: f32[1,1024], index: 4, kind: input, shape index: {}]   ;;  %s2029_s5 = inlined_call_operand.hbm [shape: bf16[2,128], index: 5, kind: output, shape index: {0}]   ;;  %s2030_s6 = inlined_call_operand.hbm [shape: bf16[2,1024], index: 6, kind: output, shape index: {1}]  }
   0x1   :  { %13 = vsyncpa [#allocation6], 0 }
   0x2   :  { %14 = vsyncpa [#allocation9], 0 }
   0x3   :  { %15 = vsyncpa [#allocation4], 0 }
   0x4   :  { %16 = vsyncpa [#allocation12], 0  ;;  %s1930_s21 = smov [#allocation5]  }
   0x5   :  { %s32_s22 = sshll.u32 %s1930_s21, 4  ;;  %s33_s22 = int_to_ptr.vmem [resolvable:$true] %s32_s22 }
   0x6   :  { %s1808_s23 = scalar_lea.vmem %s33_s22, 8192  ;;  %p1813_p1 = scmp.lt.s32.totalorder %s33_s22, %s33_s22 }
   0x7   :  { %p1809_p0 = scmp.ne.s32.totalorder %s33_s22, %s1808_s23  ;;  %p1814_p2 = scmp.lt.s32.totalorder %s1808_s23, %s1808_s23 }
   0x9   :  { %p1815_p3 = por %p1814_p2, %p1813_p1 }
   0xb   :  { %p1816_p4 = pnand %p1815_p3, %p1809_p0 }
   0xd   :  { %1819 = shalt.err (!%p1816_p4)
}
   0xe   :  { %s1931_s24 = smov 64   ;;  %s1932_s25 = smov 4  }
   0xf   :  { %38 = dma.hbm_to_vmem [thread:$0]  %s2025_s1, 8192, %s33_s22, [#allocation6], %s1931_s24, %s1931_s24, %s1932_s25  }
  0x10   :  { %s1933_s28 = smov [#allocation2]   ;;  %s1934_s30 = smov [#allocation7]  }
  0x11   :  { %s23_s29 = sshll.u32 %s1933_s28, 4  ;;  %s46_s7 = sshll.u32 %s1934_s30, 4  ;;  %s24_s29 = int_to_ptr.vmem [resolvable:$true] %s23_s29  ;;  %s47_s7 = int_to_ptr.vmem [resolvable:$true] %s46_s7 }
  0x12   :  { %s1828_s8 = scalar_lea.vmem %s24_s29, 256  ;;  %p1833_p6 = scmp.lt.s32.totalorder %s24_s29, %s24_s29 }
  0x13   :  { %p1829_p5 = scmp.ne.s32.totalorder %s24_s29, %s1828_s8  ;;  %p1834_p7 = scmp.lt.s32.totalorder %s1828_s8, %s1828_s8 }
  0x15   :  { %p1835_p8 = por %p1834_p7, %p1833_p6 }
  0x17   :  { %p1836_p9 = pnand %p1835_p8, %p1829_p5 }
  0x19   :  { %1839 = shalt.err (!%p1836_p9)
}
  0x1a   :  { %26 = dma.hbm_to_vmem [thread:$0]  %s2024_s0, 256, %s24_s29, [#allocation3]  }
  0x1b   :  { %s1848_s11 = scalar_lea.vmem %s47_s7, 8192  ;;  %p1853_p11 = scmp.lt.s32.totalorder %s47_s7, %s47_s7 }
  0x1c   :  { %p1849_p10 = scmp.ne.s32.totalorder %s47_s7, %s1848_s11  ;;  %p1854_p12 = scmp.lt.s32.totalorder %s1848_s11, %s1848_s11 }
  0x1e   :  { %p1855_p13 = por %p1854_p12, %p1853_p11 }
  0x20   :  { %p1856_p0 = pnand %p1855_p13, %p1849_p10 }
  0x22   :  { %1859 = shalt.err (!%p1856_p0)
}
  0x23   :  { %s1935_s1 = smov 512   ;;  %s1936_s12 = smov 32  }
  0x24   :  { %52 = dma.hbm_to_vmem [thread:$0]  %s2027_s3, 8192, %s47_s7, [#allocation6], %s1935_s1, %s1935_s1, %s1936_s12  }
  0x25   :  { %s1937_s15 = smov [#allocation8]  }
  0x26   :  { %s59_s16 = sshll.u32 %s1937_s15, 4  ;;  %s60_s16 = int_to_ptr.vmem [resolvable:$true] %s59_s16 }
  0x27   :  { %s1868_s17 = scalar_lea.vmem %s60_s16, 128  ;;  %p1873_p2 = scmp.lt.s32.totalorder %s60_s16, %s60_s16 }
  0x28   :  { %p1869_p1 = scmp.ne.s32.totalorder %s60_s16, %s1868_s17  ;;  %p1874_p3 = scmp.lt.s32.totalorder %s1868_s17, %s1868_s17 }
  0x2a   :  { %p1875_p4 = por %p1874_p3, %p1873_p2 }
  0x2c   :  { %p1876_p5 = pnand %p1875_p4, %p1869_p1 }
  0x2e   :  { %1879 = shalt.err (!%p1876_p5)
}
  0x2f   :  { %62 = dma.hbm_to_vmem [thread:$0]  %s2028_s4, 128, %s60_s16, [#allocation9]  }
  0x30   :  { %1920 = dma.done.wait [#allocation3], 256  }
  0x31   :  { %1921 = vsyncadd [#allocation3], 4294967040 }
  0x32   :  { %1922 = dma.done.wait [#allocation6], 16384  }
  0x33   :  { %1923 = vsyncadd [#allocation6], 4294950912 }
  0x34   :  { %1924 = dma.done.wait [#allocation9], 128  }
  0x35   :  { %1925 = vsyncadd [#allocation9], 4294967168  ;;  %v1734_v0 = vld [vmem:[#allocation5 + $0x78] sm:$0xff]   ;;  %v1738_v4 = vld [vmem:[#allocation5 + $0x70] sm:$0xff]   ;;  %v1938_v22 = vmov 1983009808   ;;  %v84_v24 = vlaneseq }
  0x36   :  { %v1735_v1 = vld [vmem:[#allocation5 + $0xf8] sm:$0xff]   ;;  %1633 = vmatprep.subr.bf16.mxu0 %v1734_v0  ;;  %v1739_v5 = vld [vmem:[#allocation5 + $0xf0] sm:$0xff]   ;;  %v1742_v8 = vld [vmem:[#allocation5 + $0x68] sm:$0xff]   ;;  %v82_v23 = vunpack.c.l.s4 %v1938_v22 }
  0x37   :  { %v1736_v2 = vld [vmem:[#allocation5 + $0x38] sm:$0xff]   ;;  %1655 = vmatprep.subr.bf16.mxu1 %v1735_v1  ;;  %v1740_v6 = vld [vmem:[#allocation5 + $0x30] sm:$0xff]   ;;  %v1743_v9 = vld [vmem:[#allocation5 + $0xe8] sm:$0xff]   ;;  %v1990_v30 = vshrl.u32 %v84_v24, 7 }
  0x38   :  { %v1737_v3 = vld [vmem:[#allocation5 + $0xb8] sm:$0xff]   ;;  %1634 = vmatpush3.bf16.msra.mxu0 %v1736_v2  ;;  %v1741_v7 = vld [vmem:[#allocation5 + $0xb0] sm:$0xff]   ;;  %v1744_v10 = vld [vmem:[#allocation5 + $0x28] sm:$0xff]   ;;  %v83_v29 = vunpack.c.0.s8 %v82_v23 }
  0x39   :  { %1656 = vmatpush3.bf16.msra.mxu1 %v1737_v3  ;;  %1635 = vmatprep.subr.bf16.mxu0 %v1738_v4  ;;  %v1745_v11 = vld [vmem:[#allocation5 + $0xa8] sm:$0xff]   ;;  %v1746_v12 = vld [vmem:[#allocation5 + $0x60] sm:$0xff]   ;;  %v1750_v16 = vld [vmem:[#allocation5 + $0x58] sm:$0xff]  }
  0x3a   :  { %1657 = vmatprep.subr.bf16.mxu1 %v1739_v5  ;;  %v1747_v13 = vld [vmem:[#allocation5 + $0xe0] sm:$0xff]   ;;  %v1751_v17 = vld [vmem:[#allocation5 + $0xd8] sm:$0xff]   ;;  %v1754_v20 = vld [vmem:[#allocation5 + $0x50] sm:$0xff]   ;;  %v1993_v35 = vsub.s32 %v83_v29, %v1990_v30 }
  0x3b   :  { %v1748_v14 = vld [vmem:[#allocation5 + $0x20] sm:$0xff]   ;;  %v1752_v18 = vld [vmem:[#allocation5 + $0x18] sm:$0xff]   ;;  %v1755_v21 = vld [vmem:[#allocation5 + $0xd0] sm:$0xff]  }
  0x3c   :  { %1636 = vmatpush3.bf16.msra.mxu0 %v1740_v6  ;;  %v1749_v15 = vld [vmem:[#allocation5 + $0xa0] sm:$0xff]   ;;  %v1753_v19 = vld [vmem:[#allocation5 + $0x98] sm:$0xff]   ;;  %v1756_v25 = vld [vmem:[#allocation5 + $0x10] sm:$0xff]  }
  0x3d   :  { %1658 = vmatpush3.bf16.msra.mxu1 %v1741_v7  ;;  %1637 = vmatprep.subr.bf16.mxu0 %v1742_v8  ;;  %v1757_v26 = vld [vmem:[#allocation5 + $0x90] sm:$0xff]   ;;  %v1758_v27 = vld [vmem:[#allocation5 + $0x48] sm:$0xff]   ;;  %v1762_v33 = vld [vmem:[#allocation5 + $0x40] sm:$0xff]  }
  0x3e   :  { %1659 = vmatprep.subr.bf16.mxu1 %v1743_v9  ;;  %v1759_v28 = vld [vmem:[#allocation5 + $0xc8] sm:$0xff]   ;;  %v1763_v34 = vld [vmem:[#allocation5 + $0xc0] sm:$0xff]   ;;  %v76_v38 = vld [vmem:[#allocation2] sm:$0xff] }
  0x3f   :  { %v1760_v31 = vld [vmem:[#allocation5 + $0x8] sm:$0xff]   ;;  %v1764_v36 = vld [vmem:[#allocation5] sm:$0xff]   ;;  %v87_v39 = vrot.slane %v76_v38, %v1993_v35  ;;  %v80_v40 = vcombine.high %v76_v38, %v76_v38  ;;  %v1767_v41 = vld [vmem:[#allocation5 + $0x178] sm:$0xff]  }
  0x40   :  { %1638 = vmatpush3.bf16.msra.mxu0 %v1744_v10  ;;  %v1761_v32 = vld [vmem:[#allocation5 + $0x88] sm:$0xff]   ;;  %v1765_v37 = vld [vmem:[#allocation5 + $0x80] sm:$0xff]   ;;  %v1768_v42 = vld [vmem:[#allocation5 + $0x1f8] sm:$0xff]  }
  0x41   :  { %1660 = vmatpush3.bf16.msra.mxu1 %v1745_v11  ;;  %1639 = vmatprep.subr.bf16.mxu0 %v1746_v12  ;;  %v95_v43 = vcombine.high %v87_v39, %v87_v39  ;;  %v94_v44 = vrot.slane %v80_v40, %v1993_v35  ;;  %v122_v45 = vpack.c.bf16 %v87_v39, %v87_v39  ;;  %v1769_v48 = vld [vmem:[#allocation5 + $0x138] sm:$0xff]   ;;  %v1771_v50 = vld [vmem:[#allocation5 + $0x170] sm:$0xff]   ;;  %v1775_v55 = vld [vmem:[#allocation5 + $0x168] sm:$0xff]  }
  0x42   :  { %1661 = vmatprep.subr.bf16.mxu1 %v1747_v13  ;;  %v1770_v52 = vld [vmem:[#allocation5 + $0x1b8] sm:$0xff]   ;;  %v1772_v53 = vld [vmem:[#allocation5 + $0x1f0] sm:$0xff]   ;;  %v1776_v57 = vld [vmem:[#allocation5 + $0x1e8] sm:$0xff]  }
  0x43   :  { %v123_v46 = vpack.c.bf16 %v95_v43, %v95_v43  ;;  %v96_v47 = vcombine.high %v94_v44, %v94_v44  ;;  %v124_v49 = vpack.c.bf16 %v94_v44, %v94_v44  ;;  %v1773_v54 = vld [vmem:[#allocation5 + $0x130] sm:$0xff]   ;;  %v1777_v58 = vld [vmem:[#allocation5 + $0x128] sm:$0xff]   ;;  %v1779_v59 = vld [vmem:[#allocation5 + $0x160] sm:$0xff]  }
  0x44   :  { %1640 = vmatpush3.bf16.msra.mxu0 %v1748_v14  ;;  %v1774_v56 = vld [vmem:[#allocation5 + $0x1b0] sm:$0xff]   ;;  %v1778_v60 = vld [vmem:[#allocation5 + $0x1a8] sm:$0xff]   ;;  %v1780_v61 = vld [vmem:[#allocation5 + $0x1e0] sm:$0xff]  }
  0x45   :  { %1662 = vmatpush3.bf16.msra.mxu1 %v1749_v15  ;;  %1641 = vmatprep.subr.bf16.mxu0 %v1750_v16  ;;  %v125_v51 = vpack.c.bf16 %v96_v47, %v96_v47  ;;  %v1781_v62 = vld [vmem:[#allocation5 + $0x120] sm:$0xff]   ;;  %v1783_v63 = vld [vmem:[#allocation5 + $0x158] sm:$0xff]   ;;  %v1787_v3 = vld [vmem:[#allocation5 + $0x150] sm:$0xff]  }
  0x46   :  { %1663 = vmatprep.subr.bf16.mxu1 %v1751_v17  ;;  %681 = vmatprep.mubr.bf16.mxu0 %v123_v46  ;;  %v1782_v0 = vld [vmem:[#allocation5 + $0x1a0] sm:$0xff]   ;;  %v1784_v1 = vld [vmem:[#allocation5 + $0x1d8] sm:$0xff]   ;;  %v1788_v5 = vld [vmem:[#allocation5 + $0x1d0] sm:$0xff]  }
  0x47   :  { %721 = vmatprep.mubr.bf16.mxu1 %v125_v51  ;;  %v1785_v2 = vld [vmem:[#allocation5 + $0x118] sm:$0xff]   ;;  %v1789_v6 = vld [vmem:[#allocation5 + $0x110] sm:$0xff]   ;;  %v1791_v7 = vld [vmem:[#allocation5 + $0x148] sm:$0xff]  }
  0x48   :  { %1642 = vmatpush3.bf16.msra.mxu0 %v1752_v18  ;;  %v1786_v4 = vld [vmem:[#allocation5 + $0x198] sm:$0xff]   ;;  %v1790_v8 = vld [vmem:[#allocation5 + $0x190] sm:$0xff]   ;;  %v1792_v9 = vld [vmem:[#allocation5 + $0x1c8] sm:$0xff]  }
  0x49   :  { %1664 = vmatpush3.bf16.msra.mxu1 %v1753_v19  ;;  %1643 = vmatprep.subr.bf16.mxu0 %v1754_v20  ;;  %v1793_v10 = vld [vmem:[#allocation5 + $0x108] sm:$0xff]   ;;  %v1795_v11 = vld [vmem:[#allocation5 + $0x140] sm:$0xff]   ;;  %v77_v14 = vld [vmem:[#allocation2 + $0x8] sm:$0xff] }
  0x4a   :  { %1665 = vmatprep.subr.bf16.mxu1 %v1755_v21  ;;  %v1794_v12 = vld [vmem:[#allocation5 + $0x188] sm:$0xff]   ;;  %v1796_v13 = vld [vmem:[#allocation5 + $0x1c0] sm:$0xff]   ;;  %v104_v16 = vrot.slane %v77_v14, %v1993_v35  ;;  %v97_v17 = vcombine.high %v77_v14, %v77_v14 }
  0x4b   :  { %v1797_v15 = vld [vmem:[#allocation5 + $0x100] sm:$0xff]   ;;  %v861_v38 = vld [vmem:[#allocation7 + $0x188] sm:$0xff] }
  0x4c   :  { %1644 = vmatpush3.bf16.msra.mxu0 %v1756_v25  ;;  %v1798_v18 = vld [vmem:[#allocation5 + $0x180] sm:$0xff]   ;;  %v112_v19 = vcombine.high %v104_v16, %v104_v16  ;;  %v111_v20 = vrot.slane %v97_v17, %v1993_v35  ;;  %v126_v21 = vpack.c.bf16 %v104_v16, %v104_v16  ;;  %v865_v39 = vld [vmem:[#allocation7 + $0x1a8] sm:$0xff] }
  0x4d   :  { %1666 = vmatpush3.bf16.msra.mxu1 %v1757_v26  ;;  %1645 = vmatprep.subr.bf16.mxu0 %v1758_v27  ;;  %v868_v26 = vld [vmem:[#allocation7 + $0x1c0] sm:$0xff]  ;;  %v853_v43 = vld [vmem:[#allocation7 + $0x148] sm:$0xff]  ;;  %v1615_v46 = vcombine.low %v861_v38, %v865_v39 }
  0x4e   :  { %1667 = vmatprep.subr.bf16.mxu1 %v1759_v28  ;;  %v127_v22 = vpack.c.bf16 %v112_v19, %v112_v19  ;;  %v113_v23 = vcombine.high %v111_v20, %v111_v20  ;;  %v128_v24 = vpack.c.bf16 %v111_v20, %v111_v20  ;;  %v872_v27 = vld [vmem:[#allocation7 + $0x1e0] sm:$0xff]  ;;  %v869_v28 = vld [vmem:[#allocation7 + $0x1c8] sm:$0xff] }
  0x4f   :  { %v1621_v29 = vcombine.low %v868_v26, %v872_v27  ;;  %v852_v40 = vld [vmem:[#allocation7 + $0x140] sm:$0xff]  ;;  %v857_v44 = vld [vmem:[#allocation7 + $0x168] sm:$0xff] }
  0x50   :  { %1646 = vmatpush3.bf16.msra.mxu0 %v1760_v31  ;;  %v129_v25 = vpack.c.bf16 %v113_v23, %v113_v23  ;;  %v1622_v31 = vcombine.high %v868_v26, %v872_v27  ;;  %v845_v51 = vld [vmem:[#allocation7 + $0x108] sm:$0xff]  ;;  %v812_v19 = vld [vmem:[#allocation7] sm:$0xff]  ;;  %v870_v27 = vld [vmem:[#allocation7 + $0x1d0] sm:$0xff] }
  0x51   :  { %1668 = vmatpush3.bf16.msra.mxu1 %v1761_v32  ;;  %1647 = vmatprep.subr.bf16.mxu0 %v1762_v33  ;;  %v873_v32 = vld [vmem:[#allocation7 + $0x1e8] sm:$0xff]  ;;  %v860_v33 = vld [vmem:[#allocation7 + $0x180] sm:$0xff] }
  0x52   :  { %1669 = vmatprep.subr.bf16.mxu1 %v1763_v34  ;;  %v864_v34 = vld [vmem:[#allocation7 + $0x1a0] sm:$0xff]  ;;  %v1623_v35 = vcombine.low %v869_v28, %v873_v32  ;;  %v817_v23 = vld [vmem:[#allocation7 + $0x28] sm:$0xff] }
  0x53   :  { %v816_v20 = vld [vmem:[#allocation7 + $0x20] sm:$0xff] }
  0x54   :  { %1648 = vmatpush3.bf16.msra.mxu0 %v1764_v36  ;;  %v1624_v36 = vcombine.high %v869_v28, %v873_v32  ;;  %v874_v28 = vld [vmem:[#allocation7 + $0x1f0] sm:$0xff]  ;;  %v875_v32 = vld [vmem:[#allocation7 + $0x1f8] sm:$0xff] }
  0x55   :  { %1670 = vmatpush3.bf16.msra.mxu1 %v1765_v37  ;;  %1677 = vmatprep.subr.bf16.mxu0 %v1767_v41  ;;  %v1614_v37 = vcombine.high %v860_v33, %v864_v34  ;;  %v1616_v41 = vcombine.high %v861_v38, %v865_v39 }
  0x56   :  { %1699 = vmatprep.subr.bf16.mxu1 %v1768_v42  ;;  %v856_v42 = vld [vmem:[#allocation7 + $0x160] sm:$0xff] }
  0x57   :  { %682 = vmatmul.mubr.bf16.vlgmr.msra.gmra.mxu0 %v122_v45  ;;  %v1613_v45 = vcombine.low %v860_v33, %v864_v34  ;;  %v1606_v47 = vcombine.high %v852_v40, %v856_v42  ;;  %v1625_v33 = vcombine.low %v870_v27, %v874_v28 }
  0x58   :  { %1678 = vmatpush3.bf16.msra.mxu0 %v1769_v48  ;;  %722 = vmatmul.mubr.bf16.vlgmr.msra.gmra.mxu1 %v124_v49  ;;  %v1608_v48 = vcombine.high %v853_v43, %v857_v44  ;;  %v844_v49 = vld [vmem:[#allocation7 + $0x100] sm:$0xff] }
  0x59   :  { %1679 = vmatprep.subr.bf16.mxu0 %v1771_v50  ;;  %1700 = vmatpush3.bf16.msra.mxu1 %v1770_v52  ;;  %v848_v50 = vld [vmem:[#allocation7 + $0x120] sm:$0xff]  ;;  %v849_v52 = vld [vmem:[#allocation7 + $0x128] sm:$0xff] }
  0x5a   :  { %1701 = vmatprep.subr.bf16.mxu1 %v1772_v53  ;;  %761 = vmatprep.mubr.bf16.mxu0 %v127_v22  ;;  %v1605_v53 = vcombine.low %v852_v40, %v856_v42  ;;  %v1566_v22 = vcombine.high %v812_v19, %v816_v20 }
  0x5b   :  { %801 = vmatprep.mubr.bf16.mxu1 %v129_v25 }
  0x5c   :  { %1680 = vmatpush3.bf16.msra.mxu0 %v1773_v54  ;;  %v1607_v54 = vcombine.low %v853_v43, %v857_v44 }
  0x5d   :  { %1681 = vmatprep.subr.bf16.mxu0 %v1775_v55  ;;  %1702 = vmatpush3.bf16.msra.mxu1 %v1774_v56  ;;  %v1598_v55 = vcombine.high %v844_v49, %v848_v50  ;;  %v1600_v56 = vcombine.high %v845_v51, %v849_v52 }
  0x5e   :  { %1703 = vmatprep.subr.bf16.mxu1 %v1776_v57  ;;  %v836_v57 = vld [vmem:[#allocation7 + $0xc0] sm:$0xff] }
  0x60   :  { %1682 = vmatpush3.bf16.msra.mxu0 %v1777_v58  ;;  %v840_v58 = vld [vmem:[#allocation7 + $0xe0] sm:$0xff] }
  0x61   :  { %1683 = vmatprep.subr.bf16.mxu0 %v1779_v59  ;;  %1704 = vmatpush3.bf16.msra.mxu1 %v1778_v60  ;;  %v837_v59 = vld [vmem:[#allocation7 + $0xc8] sm:$0xff] }
  0x62   :  { %1705 = vmatprep.subr.bf16.mxu1 %v1780_v61  ;;  %v841_v60 = vld [vmem:[#allocation7 + $0xe8] sm:$0xff]  ;;  %v1597_v61 = vcombine.low %v844_v49, %v848_v50 }
  0x64   :  { %1684 = vmatpush3.bf16.msra.mxu0 %v1781_v62  ;;  %v1599_v62 = vcombine.low %v845_v51, %v849_v52 }
  0x65   :  { %1685 = vmatprep.subr.bf16.mxu0 %v1783_v63  ;;  %1706 = vmatpush3.bf16.msra.mxu1 %v1782_v0  ;;  %v1590_v63 = vcombine.high %v836_v57, %v840_v58  ;;  %v1592_v0 = vcombine.high %v837_v59, %v841_v60 }
  0x66   :  { %1707 = vmatprep.subr.bf16.mxu1 %v1784_v1  ;;  %v1589_v1 = vcombine.low %v836_v57, %v840_v58 }
  0x68   :  { %1686 = vmatpush3.bf16.msra.mxu0 %v1785_v2  ;;  %v1591_v2 = vcombine.low %v837_v59, %v841_v60 }
  0x69   :  { %1687 = vmatprep.subr.bf16.mxu0 %v1787_v3  ;;  %1708 = vmatpush3.bf16.msra.mxu1 %v1786_v4  ;;  %v828_v3 = vld [vmem:[#allocation7 + $0x80] sm:$0xff] }
  0x6a   :  { %1709 = vmatprep.subr.bf16.mxu1 %v1788_v5  ;;  %v832_v4 = vld [vmem:[#allocation7 + $0xa0] sm:$0xff]  ;;  %v829_v5 = vld [vmem:[#allocation7 + $0x88] sm:$0xff] }
  0x6c   :  { %1688 = vmatpush3.bf16.msra.mxu0 %v1789_v6  ;;  %v1582_v6 = vcombine.high %v828_v3, %v832_v4 }
  0x6d   :  { %1689 = vmatprep.subr.bf16.mxu0 %v1791_v7  ;;  %1710 = vmatpush3.bf16.msra.mxu1 %v1790_v8  ;;  %v833_v7 = vld [vmem:[#allocation7 + $0xa8] sm:$0xff]  ;;  %v1581_v8 = vcombine.low %v828_v3, %v832_v4 }
  0x6e   :  { %1711 = vmatprep.subr.bf16.mxu1 %v1792_v9  ;;  %v1583_v9 = vcombine.low %v829_v5, %v833_v7 }
  0x70   :  { %1690 = vmatpush3.bf16.msra.mxu0 %v1793_v10  ;;  %v1584_v10 = vcombine.high %v829_v5, %v833_v7  ;;  %v858_v7 = vld [vmem:[#allocation7 + $0x170] sm:$0xff] }
  0x71   :  { %1691 = vmatprep.subr.bf16.mxu0 %v1795_v11  ;;  %1712 = vmatpush3.bf16.msra.mxu1 %v1794_v12  ;;  %v820_v11 = vld [vmem:[#allocation7 + $0x40] sm:$0xff] }
  0x72   :  { %1713 = vmatprep.subr.bf16.mxu1 %v1796_v13  ;;  %v824_v12 = vld [vmem:[#allocation7 + $0x60] sm:$0xff]  ;;  %v821_v13 = vld [vmem:[#allocation7 + $0x48] sm:$0xff] }
  0x73   :  { %v1574_v14 = vcombine.high %v820_v11, %v824_v12  ;;  %v1573_v16 = vcombine.low %v820_v11, %v824_v12 }
  0x74   :  { %1692 = vmatpush3.bf16.msra.mxu0 %v1797_v15  ;;  %v825_v15 = vld [vmem:[#allocation7 + $0x68] sm:$0xff] }
  0x75   :  { %1714 = vmatpush3.bf16.msra.mxu1 %v1798_v18  ;;  %1238 = vmatprep.subr.bf16.mxu0 %v1622_v31  ;;  %v1575_v17 = vcombine.low %v821_v13, %v825_v15  ;;  %v1576_v18 = vcombine.high %v821_v13, %v825_v15  ;;  %v1626_v31 = vcombine.high %v870_v27, %v874_v28  ;;  %v850_v15 = vld [vmem:[#allocation7 + $0x130] sm:$0xff] }
  0x76   :  { %1279 = vmatprep.subr.bf16.mxu1 %v1624_v36  ;;  %v1939_v36 = vmov 0  }
  0x77   :  { %762 = vmatmul.mubr.bf16.vlgmr.msra.gmra.mxu0 %v126_v21  ;;  %v813_v21 = vld [vmem:[#allocation7 + $0x8] sm:$0xff] }
  0x78   :  { %802 = vmatmul.mubr.bf16.vlgmr.msra.gmra.mxu1 %v128_v24  ;;  %1239 = vmatpush1.bf16.msra.mxu0 %v1621_v29  ;;  %v1565_v24 = vcombine.low %v812_v19, %v816_v20  ;;  %v1567_v25 = vcombine.low %v813_v21, %v817_v23  ;;  %v1568_v26 = vcombine.high %v813_v21, %v817_v23  ;;  %v871_v29 = vld [vmem:[#allocation7 + $0x1d8] sm:$0xff]  ;;  %v842_v23 = vld [vmem:[#allocation7 + $0xf0] sm:$0xff] }
  0x79   :  { %1280 = vmatpush1.bf16.msra.mxu1 %v1623_v35  ;;  %1240 = vmatprep.subr.bf16.mxu0 %v1614_v37  ;;  %v1627_v34 = vcombine.low %v871_v29, %v875_v32  ;;  %v1628_v35 = vcombine.high %v871_v29, %v875_v32  ;;  %v834_v32 = vld [vmem:[#allocation7 + $0xb0] sm:$0xff] }
  0x7a   :  { %1281 = vmatprep.subr.bf16.mxu1 %v1616_v41  ;;  %1270 = vmatprep.mubr.bf16.mxu0 %v1939_v36 }
  0x7b   :  { %1311 = vmatprep.mubr.bf16.mxu1 %v1939_v36 }
  0x7c   :  { %1241 = vmatpush1.bf16.msra.mxu0 %v1613_v45 }
  0x7d   :  { %1282 = vmatpush1.bf16.msra.mxu1 %v1615_v46  ;;  %1242 = vmatprep.subr.bf16.mxu0 %v1606_v47  ;;  %v1500_v46 = vld [vmem:[%s2026_s2] ss:$0 sm:$0xff]  ;;  %s1940_s2 = smov [#allocation10]  }
  0x7e   :  { %1283 = vmatprep.subr.bf16.mxu1 %v1608_v48  ;;  %s1475_s19 = sshll.u32 %s1940_s2, 4  ;;  %s1476_s19 = int_to_ptr.vmem [resolvable:$true] %s1475_s19 }
  0x7f   :  { %s1880_s20 = scalar_lea.vmem %s1476_s19, 16  ;;  %s1884_s21 = scalar_lea.vmem %s1476_s19, 32 }
  0x80   :  { %1243 = vmatpush1.bf16.msra.mxu0 %v1605_v53  ;;  %p1881_p6 = scmp.ne.s32.totalorder %s1476_s19, %s1880_s20  ;;  %p1885_p7 = scmp.lt.s32.totalorder %s1476_s19, %s1476_s19 }
  0x81   :  { %1284 = vmatpush1.bf16.msra.mxu1 %v1607_v54  ;;  %1244 = vmatprep.subr.bf16.mxu0 %v1598_v55  ;;  %p1886_p8 = scmp.lt.s32.totalorder %s1884_s21, %s1880_s20 }
  0x82   :  { %1285 = vmatprep.subr.bf16.mxu1 %v1600_v56 }
  0x83   :  { %p1887_p9 = por %p1886_p8, %p1885_p7 }
  0x84   :  { %1245 = vmatpush1.bf16.msra.mxu0 %v1597_v61  ;;  %v862_v61 = vld [vmem:[#allocation7 + $0x190] sm:$0xff] }
  0x85   :  { %1286 = vmatpush1.bf16.msra.mxu1 %v1599_v62  ;;  %1246 = vmatprep.subr.bf16.mxu0 %v1590_v63  ;;  %v866_v63 = vld [vmem:[#allocation7 + $0x1b0] sm:$0xff]  ;;  %p1888_p10 = pnand %p1887_p9, %p1881_p6 }
  0x86   :  { %1287 = vmatprep.subr.bf16.mxu1 %v1592_v0  ;;  %v863_v0 = vld [vmem:[#allocation7 + $0x198] sm:$0xff]  ;;  %v1618_v4 = vcombine.high %v862_v61, %v866_v63 }
  0x88   :  { %1247 = vmatpush1.bf16.msra.mxu0 %v1589_v1  ;;  %v867_v1 = vld [vmem:[#allocation7 + $0x1b8] sm:$0xff] }
  0x89   :  { %1288 = vmatpush1.bf16.msra.mxu1 %v1591_v2  ;;  %1248 = vmatprep.subr.bf16.mxu0 %v1582_v6  ;;  %v1620_v5 = vcombine.high %v863_v0, %v867_v1  ;;  %v854_v6 = vld [vmem:[#allocation7 + $0x150] sm:$0xff]  ;;  %v1619_v11 = vcombine.low %v863_v0, %v867_v1 }
  0x8a   :  { %1289 = vmatprep.subr.bf16.mxu1 %v1584_v10  ;;  %v1617_v10 = vcombine.low %v862_v61, %v866_v63  ;;  %v1610_v12 = vcombine.high %v854_v6, %v858_v7 }
  0x8c   :  { %1249 = vmatpush1.bf16.msra.mxu0 %v1581_v8  ;;  %v855_v8 = vld [vmem:[#allocation7 + $0x158] sm:$0xff] }
  0x8d   :  { %1290 = vmatpush1.bf16.msra.mxu1 %v1583_v9  ;;  %1250 = vmatprep.subr.bf16.mxu0 %v1574_v14  ;;  %v859_v9 = vld [vmem:[#allocation7 + $0x178] sm:$0xff]  ;;  %v846_v14 = vld [vmem:[#allocation7 + $0x110] sm:$0xff] }
  0x8e   :  { %1291 = vmatprep.subr.bf16.mxu1 %v1576_v18  ;;  %v1612_v13 = vcombine.high %v855_v8, %v859_v9  ;;  %v1609_v18 = vcombine.low %v854_v6, %v858_v7  ;;  %v1611_v19 = vcombine.low %v855_v8, %v859_v9  ;;  %v1602_v20 = vcombine.high %v846_v14, %v850_v15 }
  0x90   :  { %1251 = vmatpush1.bf16.msra.mxu0 %v1573_v16  ;;  %v847_v16 = vld [vmem:[#allocation7 + $0x118] sm:$0xff] }
  0x91   :  { %1292 = vmatpush1.bf16.msra.mxu1 %v1575_v17  ;;  %1252 = vmatprep.subr.bf16.mxu0 %v1566_v22  ;;  %v851_v17 = vld [vmem:[#allocation7 + $0x138] sm:$0xff]  ;;  %v838_v22 = vld [vmem:[#allocation7 + $0xd0] sm:$0xff] }
  0x92   :  { %1293 = vmatprep.subr.bf16.mxu1 %v1568_v26  ;;  %v1604_v21 = vcombine.high %v847_v16, %v851_v17  ;;  %v1601_v26 = vcombine.low %v846_v14, %v850_v15  ;;  %v1603_v27 = vcombine.low %v847_v16, %v851_v17  ;;  %v1594_v28 = vcombine.high %v838_v22, %v842_v23 }
  0x94   :  { %1253 = vmatpush1.bf16.msra.mxu0 %v1565_v24  ;;  %v839_v24 = vld [vmem:[#allocation7 + $0xd8] sm:$0xff] }
  0x95   :  { %1294 = vmatpush1.bf16.msra.mxu1 %v1567_v25  ;;  %1320 = vmatprep.subr.bf16.mxu0 %v1626_v31  ;;  %v843_v25 = vld [vmem:[#allocation7 + $0xf8] sm:$0xff]  ;;  %v830_v31 = vld [vmem:[#allocation7 + $0x90] sm:$0xff] }
  0x96   :  { %1361 = vmatprep.subr.bf16.mxu1 %v1628_v35  ;;  %v1596_v29 = vcombine.high %v839_v24, %v843_v25  ;;  %v1593_v35 = vcombine.low %v838_v22, %v842_v23 }
 0x117   :  { %v1649_v37 = vpop.f32.mrf.mxu0 }
 0x118   :  { %v1671_v38 = vpop.f32.mrf.mxu1 }
 0x119   :  { %v1650_v39 = vpop.f32.mrf.mxu0 }
 0x11a   :  { %v1672_v40 = vpop.f32.mrf.mxu1  ;;  %v1651_v45 = vadd.f32 %v1650_v39, %v1649_v37  ;;  %v1586_v37 = vcombine.high %v830_v31, %v834_v32  ;;  %v822_v39 = vld [vmem:[#allocation7 + $0x50] sm:$0xff] }
 0x11b   :  { %v1652_v41 = vpop.f32.mrf.mxu0  ;;  %v1673_v48 = vadd.f32 %v1672_v40, %v1671_v38  ;;  %v826_v40 = vld [vmem:[#allocation7 + $0x70] sm:$0xff] }
 0x11c   :  { %v1674_v42 = vpop.f32.mrf.mxu1  ;;  %v684_v47 = vadd.f32 %v1651_v45, %v1500_v46  ;;  %v823_v41 = vld [vmem:[#allocation7 + $0x58] sm:$0xff]  ;;  %v1578_v45 = vcombine.high %v822_v39, %v826_v40 }
 0x11d   :  { %v1653_v43 = vpop.f32.mrf.mxu0  ;;  %v827_v42 = vld [vmem:[#allocation7 + $0x78] sm:$0xff] }
 0x11e   :  { %v1675_v44 = vpop.f32.mrf.mxu1  ;;  %v724_v52 = vadd.f32 %v1673_v48, %v684_v47  ;;  %v1585_v43 = vcombine.low %v830_v31, %v834_v32  ;;  %v1580_v46 = vcombine.high %v823_v41, %v827_v42  ;;  %v814_v47 = vld [vmem:[#allocation7 + $0x10] sm:$0xff] }
 0x11f   :  { %v818_v48 = vld [vmem:[#allocation7 + $0x30] sm:$0xff] }
 0x137   :  { %v1693_v49 = vpop.f32.mrf.mxu0 }
 0x138   :  { %v1715_v50 = vpop.f32.mrf.mxu1 }
 0x139   :  { %v1694_v51 = vpop.f32.mrf.mxu0 }
 0x13a   :  { %v1695_v53 = vadd.f32 %v1694_v51, %v1693_v49  ;;  %v1716_v54 = vpop.f32.mrf.mxu1  ;;  %v815_v49 = vld [vmem:[#allocation7 + $0x18] sm:$0xff]  ;;  %v1577_v51 = vcombine.low %v822_v39, %v826_v40 }
 0x13b   :  { %v1696_v55 = vpop.f32.mrf.mxu0  ;;  %v1717_v57 = vadd.f32 %v1716_v54, %v1715_v50  ;;  %v819_v50 = vld [vmem:[#allocation7 + $0x38] sm:$0xff] }
 0x13c   :  { %v764_v56 = vadd.f32 %v1695_v53, %v724_v52  ;;  %v1718_v58 = vpop.f32.mrf.mxu1  ;;  %v1579_v52 = vcombine.low %v823_v41, %v827_v42  ;;  %v1570_v53 = vcombine.high %v814_v47, %v818_v48  ;;  %v1572_v54 = vcombine.high %v815_v49, %v819_v50 }
 0x13d   :  { %v1697_v59 = vpop.f32.mrf.mxu0  ;;  %v1569_v55 = vcombine.low %v814_v47, %v818_v48 }
 0x13e   :  { %v804_v60 = vadd.f32 %v1717_v57, %v764_v56  ;;  %v1719_v62 = vpop.f32.mrf.mxu1  ;;  %v1571_v56 = vcombine.low %v815_v49, %v819_v50 }
 0x140   :  { %v809_v2 = vmax.f32 %v804_v60, 0.0 }
 0x142   :  { %v2002_v3 = vpack.c.bf16 %v809_v2, %v809_v2 }
 0x144   :  { %811 = vst [vmem:[#allocation10] sm:$0x1] %v2002_v3  ;;  %1271 = vmatmul.mubr.bf16.vlgmr.msra.gmra.mxu0 %v2002_v3  ;;  %1312 = vmatmul.mubr.bf16.vlgmr.msra.gmra.mxu1 %v2002_v3 }
 0x145   :  { %1321 = vmatpush1.bf16.msra.mxu0 %v1625_v33  ;;  %1362 = vmatpush1.bf16.msra.mxu1 %v1627_v34  ;;  %v831_v33 = vld [vmem:[#allocation7 + $0x98] sm:$0xff] }
 0x146   :  { %1322 = vmatprep.subr.bf16.mxu0 %v1618_v4  ;;  %1363 = vmatprep.subr.bf16.mxu1 %v1620_v5  ;;  %v835_v34 = vld [vmem:[#allocation7 + $0xb8] sm:$0xff] }
 0x147   :  { %1352 = vmatprep.mubr.bf16.mxu0 %v1939_v36  ;;  %1393 = vmatprep.mubr.bf16.mxu1 %v1939_v36  ;;  %v1595_v36 = vcombine.low %v839_v24, %v843_v25  ;;  %v1588_v38 = vcombine.high %v831_v33, %v835_v34  ;;  %v1587_v44 = vcombine.low %v831_v33, %v835_v34 }
 0x149   :  { %1323 = vmatpush1.bf16.msra.mxu0 %v1617_v10  ;;  %1364 = vmatpush1.bf16.msra.mxu1 %v1619_v11 }
 0x14a   :  { %1324 = vmatprep.subr.bf16.mxu0 %v1610_v12  ;;  %1365 = vmatprep.subr.bf16.mxu1 %v1612_v13 }
 0x14d   :  { %1325 = vmatpush1.bf16.msra.mxu0 %v1609_v18  ;;  %1366 = vmatpush1.bf16.msra.mxu1 %v1611_v19 }
 0x14e   :  { %1326 = vmatprep.subr.bf16.mxu0 %v1602_v20  ;;  %1367 = vmatprep.subr.bf16.mxu1 %v1604_v21 }
 0x151   :  { %1327 = vmatpush1.bf16.msra.mxu0 %v1601_v26  ;;  %1368 = vmatpush1.bf16.msra.mxu1 %v1603_v27 }
 0x152   :  { %1328 = vmatprep.subr.bf16.mxu0 %v1594_v28  ;;  %1369 = vmatprep.subr.bf16.mxu1 %v1596_v29 }
 0x155   :  { %1329 = vmatpush1.bf16.msra.mxu0 %v1593_v35  ;;  %1370 = vmatpush1.bf16.msra.mxu1 %v1595_v36 }
 0x156   :  { %1330 = vmatprep.subr.bf16.mxu0 %v1586_v37  ;;  %1371 = vmatprep.subr.bf16.mxu1 %v1588_v38 }
 0x159   :  { %1331 = vmatpush1.bf16.msra.mxu0 %v1585_v43  ;;  %1372 = vmatpush1.bf16.msra.mxu1 %v1587_v44 }
 0x15a   :  { %1332 = vmatprep.subr.bf16.mxu0 %v1578_v45  ;;  %1373 = vmatprep.subr.bf16.mxu1 %v1580_v46 }
 0x15d   :  { %1333 = vmatpush1.bf16.msra.mxu0 %v1577_v51  ;;  %1374 = vmatpush1.bf16.msra.mxu1 %v1579_v52 }
 0x15e   :  { %1334 = vmatprep.subr.bf16.mxu0 %v1570_v53  ;;  %1375 = vmatprep.subr.bf16.mxu1 %v1572_v54 }
 0x161   :  { %1335 = vmatpush1.bf16.msra.mxu0 %v1569_v55  ;;  %1376 = vmatpush1.bf16.msra.mxu1 %v1571_v56 }
 0x164   :  { %1353 = vmatmul.mubr.bf16.vlgmr.msra.gmra.mxu0 %v2002_v3  ;;  %1394 = vmatmul.mubr.bf16.vlgmr.msra.gmra.mxu1 %v2002_v3 }
 0x165   :  { %1891 = shalt.err (!%p1888_p10)
}
 0x166   :  { %1478 = dma.vmem_to_hbm [thread:$0]  %s1476_s19, 16, %s2029_s5, [#allocation4]   ;;  %v884_v1 = vsub.s32 1, %v1990_v30  ;;  %v892_v2 = vsub.s32 3, %v1990_v30  ;;  %v880_v3 = vsub.s32 0, %v1990_v30  ;;  %v888_v4 = vsub.s32 2, %v1990_v30 }
 0x167   :  { %v876_v5 = vld [vmem:[#allocation8] sm:$0xff]  ;;  %v1941_v7 = vmov 1966171168   ;;  %v896_v15 = vsub.s32 4, %v1990_v30  ;;  %v904_v16 = vsub.s32 6, %v1990_v30  ;;  %v900_v17 = vsub.s32 5, %v1990_v30 }
 0x168   :  { %v885_v6 = vrot.slane %v876_v5, %v884_v1  ;;  %v1423_v8 = vunpack.c.l.s4 %v1941_v7  ;;  %v893_v9 = vrot.slane %v876_v5, %v892_v2  ;;  %v881_v10 = vrot.slane %v876_v5, %v880_v3  ;;  %s1942_s5 = smov [#allocation11]  }
 0x169   :  { %v889_v11 = vrot.slane %v876_v5, %v888_v4  ;;  %v908_v18 = vsub.s32 7, %v1990_v30  ;;  %v897_v24 = vrot.slane %v876_v5, %v896_v15  ;;  %v905_v25 = vrot.slane %v876_v5, %v904_v16  ;;  %s1485_s24 = sshll.u32 %s1942_s5, 4  ;;  %s1486_s24 = int_to_ptr.vmem [resolvable:$true] %s1485_s24 }
 0x16a   :  { %v1424_v13 = vunpack.c.0.s8 %v1423_v8  ;;  %v901_v26 = vrot.slane %v876_v5, %v900_v17  ;;  %s1900_s25 = scalar_lea.vmem %s1486_s24, 128  ;;  %p1905_p12 = scmp.lt.s32.totalorder %s1486_s24, %s1486_s24 }
 0x16b   :  { %v909_v27 = vrot.slane %v876_v5, %v908_v18  ;;  %p1901_p11 = scmp.ne.s32.totalorder %s1486_s24, %s1900_s25  ;;  %p1906_p13 = scmp.lt.s32.totalorder %s1900_s25, %s1900_s25 }
 0x16c   :  { %v1427_v22 = vsub.s32 %v1424_v13, %v1990_v30 }
 0x16d   :  { %p1907_p0 = por %p1906_p13, %p1905_p12 }
 0x16f   :  { %p1908_p1 = pnand %p1907_p0, %p1901_p11 }
 0x204   :  { %v1272_v57 = vpop.f32.mrf.mxu0  ;;  %v1313_v58 = vpop.f32.mrf.mxu1 }
 0x205   :  { %v1273_v19 = vadd.f32 %v1272_v57, %v881_v10  ;;  %v1314_v20 = vadd.f32 %v1313_v58, %v889_v11 }
 0x206   :  { %v1274_v59 = vpop.f32.mrf.mxu0  ;;  %v1315_v60 = vpop.f32.mrf.mxu1 }
 0x207   :  { %v1275_v12 = vadd.f32 %v1274_v59, %v885_v6  ;;  %v1316_v14 = vadd.f32 %v1315_v60, %v893_v9 }
 0x208   :  { %v1276_v61 = vpop.f32.mrf.mxu0  ;;  %v1317_v62 = vpop.f32.mrf.mxu1 }
 0x209   :  { %v1629_v21 = vpack.c.bf16 %v1275_v12, %v1273_v19  ;;  %v1630_v23 = vpack.c.bf16 %v1316_v14, %v1314_v20 }
 0x20a   :  { %v1277_v63 = vpop.f32.mrf.mxu0  ;;  %v1318_v0 = vpop.f32.mrf.mxu1 }
 0x20b   :  { %v1428_v31 = vrot.slane %v1629_v21, %v1427_v22  ;;  %v1435_v32 = vrot.slane %v1630_v23, %v1427_v22 }
 0x20d   :  { %v1450_v44 = vcombine.low %v1428_v31, %v1435_v32 }
 0x20f   :  { %v1458_v48 = vrot.slane %v1450_v44, %v1427_v22 }
 0x224   :  { %v1354_v28 = vpop.f32.mrf.mxu0  ;;  %v1395_v29 = vpop.f32.mrf.mxu1 }
 0x225   :  { %v1355_v35 = vadd.f32 %v1354_v28, %v897_v24  ;;  %v1396_v36 = vadd.f32 %v1395_v29, %v905_v25 }
 0x226   :  { %v1356_v33 = vpop.f32.mrf.mxu0  ;;  %v1397_v34 = vpop.f32.mrf.mxu1 }
 0x227   :  { %v1357_v37 = vadd.f32 %v1356_v33, %v901_v26  ;;  %v1398_v38 = vadd.f32 %v1397_v34, %v909_v27 }
 0x228   :  { %v1358_v39 = vpop.f32.mrf.mxu0  ;;  %v1399_v40 = vpop.f32.mrf.mxu1 }
 0x229   :  { %v1631_v41 = vpack.c.bf16 %v1357_v37, %v1355_v35  ;;  %v1632_v42 = vpack.c.bf16 %v1398_v38, %v1396_v36 }
 0x22a   :  { %v1359_v30 = vpop.f32.mrf.mxu0  ;;  %v1400_v43 = vpop.f32.mrf.mxu1 }
 0x22b   :  { %v1442_v45 = vrot.slane %v1631_v41, %v1427_v22  ;;  %v1449_v46 = vrot.slane %v1632_v42, %v1427_v22 }
 0x22d   :  { %v1451_v47 = vcombine.low %v1442_v45, %v1449_v46 }
 0x22f   :  { %v1465_v49 = vrot.slane %v1451_v47, %v1427_v22 }
 0x231   :  { %v1466_v50 = vcombine.low %v1458_v48, %v1465_v49 }
 0x233   :  { %1468 = vst [vmem:[#allocation11] sm:$0xff] %v1466_v50 }
 0x234   :  { %1911 = shalt.err (!%p1908_p1)
}
 0x235   :  { %1488 = dma.vmem_to_hbm [thread:$0]  %s1486_s24, 128, %s2030_s6, [#allocation12]  }
 0x236   :  { %1926 = dma.done.wait [#allocation4], 16  }
 0x237   :  { %1927 = vsyncadd [#allocation4], 4294967280 }
 0x238   :  { %1928 = dma.done.wait [#allocation12], 128  }
 0x239   :  { %1929 = vsyncadd [#allocation12], 4294967168 }
 0x23a   :  { %1495 = vsyncpa [#allocation3], 1 }
 0x23b   :  { %1496 = vsyncpa [#allocation6], 1 }
 0x23c   :  { %1497 = vsyncpa [#allocation9], 1 }
 0x23d   :  { %1498 = vsyncpa [#allocation4], 1 }
 0x23e   :  { %1499 = vsyncpa [#allocation12], 1 }

// kernel: tpu_custom_call.1
= control target key start
LH: loop header
LB: loop body
LE: loop exit
PB: predicated region body
PF: predicated region fallthrough
CT: control target
= control target key end

     0   :  { %12 = vsyncpa [#allocation3], 0  ;;  %s2024_s0 = inlined_call_operand.hbm [shape: f32[2,1024], index: 0, kind: input, shape index: {}]   ;;  %s2025_s1 = inlined_call_operand.hbm [shape: bf16[1024,128], index: 1, kind: input, shape index: {}]   ;;  %s2026_s2 = inlined_call_operand.vmem [shape: f32[1,128], index: 2, kind: input, shape index: {}]   ;;  %s2027_s3 = inlined_call_operand.hbm [shape: bf16[128,1024], index: 3, kind: input, shape index: {}]   ;;  %s2028_s4 = inlined_call_operand.hbm [shape: f32[1,1024], index: 4, kind: input, shape index: {}]   ;;  %s2029_s5 = inlined_call_operand.hbm [shape: bf16[2,128], index: 5, kind: output, shape index: {0}]   ;;  %s2030_s6 = inlined_call_operand.hbm [shape: bf16[2,1024], index: 6, kind: output, shape index: {1}]  }
   0x1   :  { %13 = vsyncpa [#allocation6], 0 }
   0x2   :  { %14 = vsyncpa [#allocation9], 0 }
   0x3   :  { %15 = vsyncpa [#allocation4], 0 }
   0x4   :  { %16 = vsyncpa [#allocation12], 0  ;;  %s1930_s21 = smov [#allocation5]  }
   0x5   :  { %s32_s22 = sshll.u32 %s1930_s21, 4  ;;  %s33_s22 = int_to_ptr.vmem [resolvable:$true] %s32_s22 }
   0x6   :  { %s1808_s23 = scalar_lea.vmem %s33_s22, 8192  ;;  %p1813_p1 = scmp.lt.s32.totalorder %s33_s22, %s33_s22 }
   0x7   :  { %p1809_p0 = scmp.ne.s32.totalorder %s33_s22, %s1808_s23  ;;  %p1814_p2 = scmp.lt.s32.totalorder %s1808_s23, %s1808_s23 }
   0x9   :  { %p1815_p3 = por %p1814_p2, %p1813_p1 }
   0xb   :  { %p1816_p4 = pnand %p1815_p3, %p1809_p0 }
   0xd   :  { %1819 = shalt.err (!%p1816_p4)
}
   0xe   :  { %s1931_s24 = smov 64   ;;  %s1932_s25 = smov 4  }
   0xf   :  { %38 = dma.hbm_to_vmem [thread:$0]  %s2025_s1, 8192, %s33_s22, [#allocation6], %s1931_s24, %s1931_s24, %s1932_s25  }
  0x10   :  { %s1933_s28 = smov [#allocation2]   ;;  %s1934_s30 = smov [#allocation7]  }
  0x11   :  { %s23_s29 = sshll.u32 %s1933_s28, 4  ;;  %s46_s7 = sshll.u32 %s1934_s30, 4  ;;  %s24_s29 = int_to_ptr.vmem [resolvable:$true] %s23_s29  ;;  %s47_s7 = int_to_ptr.vmem [resolvable:$true] %s46_s7 }
  0x12   :  { %s1828_s8 = scalar_lea.vmem %s24_s29, 256  ;;  %p1833_p6 = scmp.lt.s32.totalorder %s24_s29, %s24_s29 }
  0x13   :  { %p1829_p5 = scmp.ne.s32.totalorder %s24_s29, %s1828_s8  ;;  %p1834_p7 = scmp.lt.s32.totalorder %s1828_s8, %s1828_s8 }
  0x15   :  { %p1835_p8 = por %p1834_p7, %p1833_p6 }
  0x17   :  { %p1836_p9 = pnand %p1835_p8, %p1829_p5 }
  0x19   :  { %1839 = shalt.err (!%p1836_p9)
}
  0x1a   :  { %26 = dma.hbm_to_vmem [thread:$0]  %s2024_s0, 256, %s24_s29, [#allocation3]  }
  0x1b   :  { %s1848_s11 = scalar_lea.vmem %s47_s7, 8192  ;;  %p1853_p11 = scmp.lt.s32.totalorder %s47_s7, %s47_s7 }
  0x1c   :  { %p1849_p10 = scmp.ne.s32.totalorder %s47_s7, %s1848_s11  ;;  %p1854_p12 = scmp.lt.s32.totalorder %s1848_s11, %s1848_s11 }
  0x1e   :  { %p1855_p13 = por %p1854_p12, %p1853_p11 }
  0x20   :  { %p1856_p0 = pnand %p1855_p13, %p1849_p10 }
  0x22   :  { %1859 = shalt.err (!%p1856_p0)
}
  0x23   :  { %s1935_s1 = smov 512   ;;  %s1936_s12 = smov 32  }
  0x24   :  { %52 = dma.hbm_to_vmem [thread:$0]  %s2027_s3, 8192, %s47_s7, [#allocation6], %s1935_s1, %s1935_s1, %s1936_s12  }
  0x25   :  { %s1937_s15 = smov [#allocation8]  }
  0x26   :  { %s59_s16 = sshll.u32 %s1937_s15, 4  ;;  %s60_s16 = int_to_ptr.vmem [resolvable:$true] %s59_s16 }
  0x27   :  { %s1868_s17 = scalar_lea.vmem %s60_s16, 128  ;;  %p1873_p2 = scmp.lt.s32.totalorder %s60_s16, %s60_s16 }
  0x28   :  { %p1869_p1 = scmp.ne.s32.totalorder %s60_s16, %s1868_s17  ;;  %p1874_p3 = scmp.lt.s32.totalorder %s1868_s17, %s1868_s17 }
  0x2a   :  { %p1875_p4 = por %p1874_p3, %p1873_p2 }
  0x2c   :  { %p1876_p5 = pnand %p1875_p4, %p1869_p1 }
  0x2e   :  { %1879 = shalt.err (!%p1876_p5)
}
  0x2f   :  { %62 = dma.hbm_to_vmem [thread:$0]  %s2028_s4, 128, %s60_s16, [#allocation9]  }
  0x30   :  { %1920 = dma.done.wait [#allocation3], 256  }
  0x31   :  { %1921 = vsyncadd [#allocation3], 4294967040 }
  0x32   :  { %1922 = dma.done.wait [#allocation6], 16384  }
  0x33   :  { %1923 = vsyncadd [#allocation6], 4294950912 }
  0x34   :  { %1924 = dma.done.wait [#allocation9], 128  }
  0x35   :  { %1925 = vsyncadd [#allocation9], 4294967168  ;;  %v1734_v0 = vld [vmem:[#allocation5 + $0x78] sm:$0xff]   ;;  %v1738_v4 = vld [vmem:[#allocation5 + $0x70] sm:$0xff]   ;;  %v1938_v22 = vmov 1983009808   ;;  %v84_v24 = vlaneseq }
  0x36   :  { %v1735_v1 = vld [vmem:[#allocation5 + $0xf8] sm:$0xff]   ;;  %1633 = vmatprep.subr.bf16.mxu0 %v1734_v0  ;;  %v1739_v5 = vld [vmem:[#allocation5 + $0xf0] sm:$0xff]   ;;  %v1742_v8 = vld [vmem:[#allocation5 + $0x68] sm:$0xff]   ;;  %v82_v23 = vunpack.c.l.s4 %v1938_v22 }
  0x37   :  { %v1736_v2 = vld [vmem:[#allocation5 + $0x38] sm:$0xff]   ;;  %1655 = vmatprep.subr.bf16.mxu1 %v1735_v1  ;;  %v1740_v6 = vld [vmem:[#allocation5 + $0x30] sm:$0xff]   ;;  %v1743_v9 = vld [vmem:[#allocation5 + $0xe8] sm:$0xff]   ;;  %v1990_v30 = vshrl.u32 %v84_v24, 7 }
  0x38   :  { %v1737_v3 = vld [vmem:[#allocation5 + $0xb8] sm:$0xff]   ;;  %1634 = vmatpush3.bf16.msra.mxu0 %v1736_v2  ;;  %v1741_v7 = vld [vmem:[#allocation5 + $0xb0] sm:$0xff]   ;;  %v1744_v10 = vld [vmem:[#allocation5 + $0x28] sm:$0xff]   ;;  %v83_v29 = vunpack.c.0.s8 %v82_v23 }
  0x39   :  { %1656 = vmatpush3.bf16.msra.mxu1 %v1737_v3  ;;  %1635 = vmatprep.subr.bf16.mxu0 %v1738_v4  ;;  %v1745_v11 = vld [vmem:[#allocation5 + $0xa8] sm:$0xff]   ;;  %v1746_v12 = vld [vmem:[#allocation5 + $0x60] sm:$0xff]   ;;  %v1750_v16 = vld [vmem:[#allocation5 + $0x58] sm:$0xff]  }
  0x3a   :  { %1657 = vmatprep.subr.bf16.mxu1 %v1739_v5  ;;  %v1747_v13 = vld [vmem:[#allocation5 + $0xe0] sm:$0xff]   ;;  %v1751_v17 = vld [vmem:[#allocation5 + $0xd8] sm:$0xff]   ;;  %v1754_v20 = vld [vmem:[#allocation5 + $0x50] sm:$0xff]   ;;  %v1993_v35 = vsub.s32 %v83_v29, %v1990_v30 }
  0x3b   :  { %v1748_v14 = vld [vmem:[#allocation5 + $0x20] sm:$0xff]   ;;  %v1752_v18 = vld [vmem:[#allocation5 + $0x18] sm:$0xff]   ;;  %v1755_v21 = vld [vmem:[#allocation5 + $0xd0] sm:$0xff]  }
  0x3c   :  { %1636 = vmatpush3.bf16.msra.mxu0 %v1740_v6  ;;  %v1749_v15 = vld [vmem:[#allocation5 + $0xa0] sm:$0xff]   ;;  %v1753_v19 = vld [vmem:[#allocation5 + $0x98] sm:$0xff]   ;;  %v1756_v25 = vld [vmem:[#allocation5 + $0x10] sm:$0xff]  }
  0x3d   :  { %1658 = vmatpush3.bf16.msra.mxu1 %v1741_v7  ;;  %1637 = vmatprep.subr.bf16.mxu0 %v1742_v8  ;;  %v1757_v26 = vld [vmem:[#allocation5 + $0x90] sm:$0xff]   ;;  %v1758_v27 = vld [vmem:[#allocation5 + $0x48] sm:$0xff]   ;;  %v1762_v33 = vld [vmem:[#allocation5 + $0x40] sm:$0xff]  }
  0x3e   :  { %1659 = vmatprep.subr.bf16.mxu1 %v1743_v9  ;;  %v1759_v28 = vld [vmem:[#allocation5 + $0xc8] sm:$0xff]   ;;  %v1763_v34 = vld [vmem:[#allocation5 + $0xc0] sm:$0xff]   ;;  %v76_v38 = vld [vmem:[#allocation2] sm:$0xff] }
  0x3f   :  { %v1760_v31 = vld [vmem:[#allocation5 + $0x8] sm:$0xff]   ;;  %v1764_v36 = vld [vmem:[#allocation5] sm:$0xff]   ;;  %v87_v39 = vrot.slane %v76_v38, %v1993_v35  ;;  %v80_v40 = vcombine.high %v76_v38, %v76_v38  ;;  %v1767_v41 = vld [vmem:[#allocation5 + $0x178] sm:$0xff]  }
  0x40   :  { %1638 = vmatpush3.bf16.msra.mxu0 %v1744_v10  ;;  %v1761_v32 = vld [vmem:[#allocation5 + $0x88] sm:$0xff]   ;;  %v1765_v37 = vld [vmem:[#allocation5 + $0x80] sm:$0xff]   ;;  %v1768_v42 = vld [vmem:[#allocation5 + $0x1f8] sm:$0xff]  }
  0x41   :  { %1660 = vmatpush3.bf16.msra.mxu1 %v1745_v11  ;;  %1639 = vmatprep.subr.bf16.mxu0 %v1746_v12  ;;  %v95_v43 = vcombine.high %v87_v39, %v87_v39  ;;  %v94_v44 = vrot.slane %v80_v40, %v1993_v35  ;;  %v122_v45 = vpack.c.bf16 %v87_v39, %v87_v39  ;;  %v1769_v48 = vld [vmem:[#allocation5 + $0x138] sm:$0xff]   ;;  %v1771_v50 = vld [vmem:[#allocation5 + $0x170] sm:$0xff]   ;;  %v1775_v55 = vld [vmem:[#allocation5 + $0x168] sm:$0xff]  }
  0x42   :  { %1661 = vmatprep.subr.bf16.mxu1 %v1747_v13  ;;  %v1770_v52 = vld [vmem:[#allocation5 + $0x1b8] sm:$0xff]   ;;  %v1772_v53 = vld [vmem:[#allocation5 + $0x1f0] sm:$0xff]   ;;  %v1776_v57 = vld [vmem:[#allocation5 + $0x1e8] sm:$0xff]  }
  0x43   :  { %v123_v46 = vpack.c.bf16 %v95_v43, %v95_v43  ;;  %v96_v47 = vcombine.high %v94_v44, %v94_v44  ;;  %v124_v49 = vpack.c.bf16 %v94_v44, %v94_v44  ;;  %v1773_v54 = vld [vmem:[#allocation5 + $0x130] sm:$0xff]   ;;  %v1777_v58 = vld [vmem:[#allocation5 + $0x128] sm:$0xff]   ;;  %v1779_v59 = vld [vmem:[#allocation5 + $0x160] sm:$0xff]  }
  0x44   :  { %1640 = vmatpush3.bf16.msra.mxu0 %v1748_v14  ;;  %v1774_v56 = vld [vmem:[#allocation5 + $0x1b0] sm:$0xff]   ;;  %v1778_v60 = vld [vmem:[#allocation5 + $0x1a8] sm:$0xff]   ;;  %v1780_v61 = vld [vmem:[#allocation5 + $0x1e0] sm:$0xff]  }
  0x45   :  { %1662 = vmatpush3.bf16.msra.mxu1 %v1749_v15  ;;  %1641 = vmatprep.subr.bf16.mxu0 %v1750_v16  ;;  %v125_v51 = vpack.c.bf16 %v96_v47, %v96_v47  ;;  %v1781_v62 = vld [vmem:[#allocation5 + $0x120] sm:$0xff]   ;;  %v1783_v63 = vld [vmem:[#allocation5 + $0x158] sm:$0xff]   ;;  %v1787_v3 = vld [vmem:[#allocation5 + $0x150] sm:$0xff]  }
  0x46   :  { %1663 = vmatprep.subr.bf16.mxu1 %v1751_v17  ;;  %681 = vmatprep.mubr.bf16.mxu0 %v123_v46  ;;  %v1782_v0 = vld [vmem:[#allocation5 + $0x1a0] sm:$0xff]   ;;  %v1784_v1 = vld [vmem:[#allocation5 + $0x1d8] sm:$0xff]   ;;  %v1788_v5 = vld [vmem:[#allocation5 + $0x1d0] sm:$0xff]  }
  0x47   :  { %721 = vmatprep.mubr.bf16.mxu1 %v125_v51  ;;  %v1785_v2 = vld [vmem:[#allocation5 + $0x118] sm:$0xff]   ;;  %v1789_v6 = vld [vmem:[#allocation5 + $0x110] sm:$0xff]   ;;  %v1791_v7 = vld [vmem:[#allocation5 + $0x148] sm:$0xff]  }
  0x48   :  { %1642 = vmatpush3.bf16.msra.mxu0 %v1752_v18  ;;  %v1786_v4 = vld [vmem:[#allocation5 + $0x198] sm:$0xff]   ;;  %v1790_v8 = vld [vmem:[#allocation5 + $0x190] sm:$0xff]   ;;  %v1792_v9 = vld [vmem:[#allocation5 + $0x1c8] sm:$0xff]  }
  0x49   :  { %1664 = vmatpush3.bf16.msra.mxu1 %v1753_v19  ;;  %1643 = vmatprep.subr.bf16.mxu0 %v1754_v20  ;;  %v1793_v10 = vld [vmem:[#allocation5 + $0x108] sm:$0xff]   ;;  %v1795_v11 = vld [vmem:[#allocation5 + $0x140] sm:$0xff]   ;;  %v77_v14 = vld [vmem:[#allocation2 + $0x8] sm:$0xff] }
  0x4a   :  { %1665 = vmatprep.subr.bf16.mxu1 %v1755_v21  ;;  %v1794_v12 = vld [vmem:[#allocation5 + $0x188] sm:$0xff]   ;;  %v1796_v13 = vld [vmem:[#allocation5 + $0x1c0] sm:$0xff]   ;;  %v104_v16 = vrot.slane %v77_v14, %v1993_v35  ;;  %v97_v17 = vcombine.high %v77_v14, %v77_v14 }
  0x4b   :  { %v1797_v15 = vld [vmem:[#allocation5 + $0x100] sm:$0xff]   ;;  %v861_v38 = vld [vmem:[#allocation7 + $0x188] sm:$0xff] }
  0x4c   :  { %1644 = vmatpush3.bf16.msra.mxu0 %v1756_v25  ;;  %v1798_v18 = vld [vmem:[#allocation5 + $0x180] sm:$0xff]   ;;  %v112_v19 = vcombine.high %v104_v16, %v104_v16  ;;  %v111_v20 = vrot.slane %v97_v17, %v1993_v35  ;;  %v126_v21 = vpack.c.bf16 %v104_v16, %v104_v16  ;;  %v865_v39 = vld [vmem:[#allocation7 + $0x1a8] sm:$0xff] }
  0x4d   :  { %1666 = vmatpush3.bf16.msra.mxu1 %v1757_v26  ;;  %1645 = vmatprep.subr.bf16.mxu0 %v1758_v27  ;;  %v868_v26 = vld [vmem:[#allocation7 + $0x1c0] sm:$0xff]  ;;  %v853_v43 = vld [vmem:[#allocation7 + $0x148] sm:$0xff]  ;;  %v1615_v46 = vcombine.low %v861_v38, %v865_v39 }
  0x4e   :  { %1667 = vmatprep.subr.bf16.mxu1 %v1759_v28  ;;  %v127_v22 = vpack.c.bf16 %v112_v19, %v112_v19  ;;  %v113_v23 = vcombine.high %v111_v20, %v111_v20  ;;  %v128_v24 = vpack.c.bf16 %v111_v20, %v111_v20  ;;  %v872_v27 = vld [vmem:[#allocation7 + $0x1e0] sm:$0xff]  ;;  %v869_v28 = vld [vmem:[#allocation7 + $0x1c8] sm:$0xff] }
  0x4f   :  { %v1621_v29 = vcombine.low %v868_v26, %v872_v27  ;;  %v852_v40 = vld [vmem:[#allocation7 + $0x140] sm:$0xff]  ;;  %v857_v44 = vld [vmem:[#allocation7 + $0x168] sm:$0xff] }
  0x50   :  { %1646 = vmatpush3.bf16.msra.mxu0 %v1760_v31  ;;  %v129_v25 = vpack.c.bf16 %v113_v23, %v113_v23  ;;  %v1622_v31 = vcombine.high %v868_v26, %v872_v27  ;;  %v845_v51 = vld [vmem:[#allocation7 + $0x108] sm:$0xff]  ;;  %v812_v19 = vld [vmem:[#allocation7] sm:$0xff]  ;;  %v870_v27 = vld [vmem:[#allocation7 + $0x1d0] sm:$0xff] }
  0x51   :  { %1668 = vmatpush3.bf16.msra.mxu1 %v1761_v32  ;;  %1647 = vmatprep.subr.bf16.mxu0 %v1762_v33  ;;  %v873_v32 = vld [vmem:[#allocation7 + $0x1e8] sm:$0xff]  ;;  %v860_v33 = vld [vmem:[#allocation7 + $0x180] sm:$0xff] }
  0x52   :  { %1669 = vmatprep.subr.bf16.mxu1 %v1763_v34  ;;  %v864_v34 = vld [vmem:[#allocation7 + $0x1a0] sm:$0xff]  ;;  %v1623_v35 = vcombine.low %v869_v28, %v873_v32  ;;  %v817_v23 = vld [vmem:[#allocation7 + $0x28] sm:$0xff] }
  0x53   :  { %v816_v20 = vld [vmem:[#allocation7 + $0x20] sm:$0xff] }
  0x54   :  { %1648 = vmatpush3.bf16.msra.mxu0 %v1764_v36  ;;  %v1624_v36 = vcombine.high %v869_v28, %v873_v32  ;;  %v874_v28 = vld [vmem:[#allocation7 + $0x1f0] sm:$0xff]  ;;  %v875_v32 = vld [vmem:[#allocation7 + $0x1f8] sm:$0xff] }
  0x55   :  { %1670 = vmatpush3.bf16.msra.mxu1 %v1765_v37  ;;  %1677 = vmatprep.subr.bf16.mxu0 %v1767_v41  ;;  %v1614_v37 = vcombine.high %v860_v33, %v864_v34  ;;  %v1616_v41 = vcombine.high %v861_v38, %v865_v39 }
  0x56   :  { %1699 = vmatprep.subr.bf16.mxu1 %v1768_v42  ;;  %v856_v42 = vld [vmem:[#allocation7 + $0x160] sm:$0xff] }
  0x57   :  { %682 = vmatmul.mubr.bf16.vlgmr.msra.gmra.mxu0 %v122_v45  ;;  %v1613_v45 = vcombine.low %v860_v33, %v864_v34  ;;  %v1606_v47 = vcombine.high %v852_v40, %v856_v42  ;;  %v1625_v33 = vcombine.low %v870_v27, %v874_v28 }
  0x58   :  { %1678 = vmatpush3.bf16.msra.mxu0 %v1769_v48  ;;  %722 = vmatmul.mubr.bf16.vlgmr.msra.gmra.mxu1 %v124_v49  ;;  %v1608_v48 = vcombine.high %v853_v43, %v857_v44  ;;  %v844_v49 = vld [vmem:[#allocation7 + $0x100] sm:$0xff] }
  0x59   :  { %1679 = vmatprep.subr.bf16.mxu0 %v1771_v50  ;;  %1700 = vmatpush3.bf16.msra.mxu1 %v1770_v52  ;;  %v848_v50 = vld [vmem:[#allocation7 + $0x120] sm:$0xff]  ;;  %v849_v52 = vld [vmem:[#allocation7 + $0x128] sm:$0xff] }
  0x5a   :  { %1701 = vmatprep.subr.bf16.mxu1 %v1772_v53  ;;  %761 = vmatprep.mubr.bf16.mxu0 %v127_v22  ;;  %v1605_v53 = vcombine.low %v852_v40, %v856_v42  ;;  %v1566_v22 = vcombine.high %v812_v19, %v816_v20 }
  0x5b   :  { %801 = vmatprep.mubr.bf16.mxu1 %v129_v25 }
  0x5c   :  { %1680 = vmatpush3.bf16.msra.mxu0 %v1773_v54  ;;  %v1607_v54 = vcombine.low %v853_v43, %v857_v44 }
  0x5d   :  { %1681 = vmatprep.subr.bf16.mxu0 %v1775_v55  ;;  %1702 = vmatpush3.bf16.msra.mxu1 %v1774_v56  ;;  %v1598_v55 = vcombine.high %v844_v49, %v848_v50  ;;  %v1600_v56 = vcombine.high %v845_v51, %v849_v52 }
  0x5e   :  { %1703 = vmatprep.subr.bf16.mxu1 %v1776_v57  ;;  %v836_v57 = vld [vmem:[#allocation7 + $0xc0] sm:$0xff] }
  0x60   :  { %1682 = vmatpush3.bf16.msra.mxu0 %v1777_v58  ;;  %v840_v58 = vld [vmem:[#allocation7 + $0xe0] sm:$0xff] }
  0x61   :  { %1683 = vmatprep.subr.bf16.mxu0 %v1779_v59  ;;  %1704 = vmatpush3.bf16.msra.mxu1 %v1778_v60  ;;  %v837_v59 = vld [vmem:[#allocation7 + $0xc8] sm:$0xff] }
  0x62   :  { %1705 = vmatprep.subr.bf16.mxu1 %v1780_v61  ;;  %v841_v60 = vld [vmem:[#allocation7 + $0xe8] sm:$0xff]  ;;  %v1597_v61 = vcombine.low %v844_v49, %v848_v50 }
  0x64   :  { %1684 = vmatpush3.bf16.msra.mxu0 %v1781_v62  ;;  %v1599_v62 = vcombine.low %v845_v51, %v849_v52 }
  0x65   :  { %1685 = vmatprep.subr.bf16.mxu0 %v1783_v63  ;;  %1706 = vmatpush3.bf16.msra.mxu1 %v1782_v0  ;;  %v1590_v63 = vcombine.high %v836_v57, %v840_v58  ;;  %v1592_v0 = vcombine.high %v837_v59, %v841_v60 }
  0x66   :  { %1707 = vmatprep.subr.bf16.mxu1 %v1784_v1  ;;  %v1589_v1 = vcombine.low %v836_v57, %v840_v58 }
  0x68   :  { %1686 = vmatpush3.bf16.msra.mxu0 %v1785_v2  ;;  %v1591_v2 = vcombine.low %v837_v59, %v841_v60 }
  0x69   :  { %1687 = vmatprep.subr.bf16.mxu0 %v1787_v3  ;;  %1708 = vmatpush3.bf16.msra.mxu1 %v1786_v4  ;;  %v828_v3 = vld [vmem:[#allocation7 + $0x80] sm:$0xff] }
  0x6a   :  { %1709 = vmatprep.subr.bf16.mxu1 %v1788_v5  ;;  %v832_v4 = vld [vmem:[#allocation7 + $0xa0] sm:$0xff]  ;;  %v829_v5 = vld [vmem:[#allocation7 + $0x88] sm:$0xff] }
  0x6c   :  { %1688 = vmatpush3.bf16.msra.mxu0 %v1789_v6  ;;  %v1582_v6 = vcombine.high %v828_v3, %v832_v4 }
  0x6d   :  { %1689 = vmatprep.subr.bf16.mxu0 %v1791_v7  ;;  %1710 = vmatpush3.bf16.msra.mxu1 %v1790_v8  ;;  %v833_v7 = vld [vmem:[#allocation7 + $0xa8] sm:$0xff]  ;;  %v1581_v8 = vcombine.low %v828_v3, %v832_v4 }
  0x6e   :  { %1711 = vmatprep.subr.bf16.mxu1 %v1792_v9  ;;  %v1583_v9 = vcombine.low %v829_v5, %v833_v7 }
  0x70   :  { %1690 = vmatpush3.bf16.msra.mxu0 %v1793_v10  ;;  %v1584_v10 = vcombine.high %v829_v5, %v833_v7  ;;  %v858_v7 = vld [vmem:[#allocation7 + $0x170] sm:$0xff] }
  0x71   :  { %1691 = vmatprep.subr.bf16.mxu0 %v1795_v11  ;;  %1712 = vmatpush3.bf16.msra.mxu1 %v1794_v12  ;;  %v820_v11 = vld [vmem:[#allocation7 + $0x40] sm:$0xff] }
  0x72   :  { %1713 = vmatprep.subr.bf16.mxu1 %v1796_v13  ;;  %v824_v12 = vld [vmem:[#allocation7 + $0x60] sm:$0xff]  ;;  %v821_v13 = vld [vmem:[#allocation7 + $0x48] sm:$0xff] }
  0x73   :  { %v1574_v14 = vcombine.high %v820_v11, %v824_v12  ;;  %v1573_v16 = vcombine.low %v820_v11, %v824_v12 }
  0x74   :  { %1692 = vmatpush3.bf16.msra.mxu0 %v1797_v15  ;;  %v825_v15 = vld [vmem:[#allocation7 + $0x68] sm:$0xff] }
  0x75   :  { %1714 = vmatpush3.bf16.msra.mxu1 %v1798_v18  ;;  %1238 = vmatprep.subr.bf16.mxu0 %v1622_v31  ;;  %v1575_v17 = vcombine.low %v821_v13, %v825_v15  ;;  %v1576_v18 = vcombine.high %v821_v13, %v825_v15  ;;  %v1626_v31 = vcombine.high %v870_v27, %v874_v28  ;;  %v850_v15 = vld [vmem:[#allocation7 + $0x130] sm:$0xff] }
  0x76   :  { %1279 = vmatprep.subr.bf16.mxu1 %v1624_v36  ;;  %v1939_v36 = vmov 0  }
  0x77   :  { %762 = vmatmul.mubr.bf16.vlgmr.msra.gmra.mxu0 %v126_v21  ;;  %v813_v21 = vld [vmem:[#allocation7 + $0x8] sm:$0xff] }
  0x78   :  { %802 = vmatmul.mubr.bf16.vlgmr.msra.gmra.mxu1 %v128_v24  ;;  %1239 = vmatpush1.bf16.msra.mxu0 %v1621_v29  ;;  %v1565_v24 = vcombine.low %v812_v19, %v816_v20  ;;  %v1567_v25 = vcombine.low %v813_v21, %v817_v23  ;;  %v1568_v26 = vcombine.high %v813_v21, %v817_v23  ;;  %v871_v29 = vld [vmem:[#allocation7 + $0x1d8] sm:$0xff]  ;;  %v842_v23 = vld [vmem:[#allocation7 + $0xf0] sm:$0xff] }
  0x79   :  { %1280 = vmatpush1.bf16.msra.mxu1 %v1623_v35  ;;  %1240 = vmatprep.subr.bf16.mxu0 %v1614_v37  ;;  %v1627_v34 = vcombine.low %v871_v29, %v875_v32  ;;  %v1628_v35 = vcombine.high %v871_v29, %v875_v32  ;;  %v834_v32 = vld [vmem:[#allocation7 + $0xb0] sm:$0xff] }
  0x7a   :  { %1281 = vmatprep.subr.bf16.mxu1 %v1616_v41  ;;  %1270 = vmatprep.mubr.bf16.mxu0 %v1939_v36 }
  0x7b   :  { %1311 = vmatprep.mubr.bf16.mxu1 %v1939_v36 }
  0x7c   :  { %1241 = vmatpush1.bf16.msra.mxu0 %v1613_v45 }
  0x7d   :  { %1282 = vmatpush1.bf16.msra.mxu1 %v1615_v46  ;;  %1242 = vmatprep.subr.bf16.mxu0 %v1606_v47  ;;  %v1500_v46 = vld [vmem:[%s2026_s2] ss:$0 sm:$0xff]  ;;  %s1940_s2 = smov [#allocation10]  }
  0x7e   :  { %1283 = vmatprep.subr.bf16.mxu1 %v1608_v48  ;;  %s1475_s19 = sshll.u32 %s1940_s2, 4  ;;  %s1476_s19 = int_to_ptr.vmem [resolvable:$true] %s1475_s19 }
  0x7f   :  { %s1880_s20 = scalar_lea.vmem %s1476_s19, 16  ;;  %s1884_s21 = scalar_lea.vmem %s1476_s19, 32 }
  0x80   :  { %1243 = vmatpush1.bf16.msra.mxu0 %v1605_v53  ;;  %p1881_p6 = scmp.ne.s32.totalorder %s1476_s19, %s1880_s20  ;;  %p1885_p7 = scmp.lt.s32.totalorder %s1476_s19, %s1476_s19 }
  0x81   :  { %1284 = vmatpush1.bf16.msra.mxu1 %v1607_v54  ;;  %1244 = vmatprep.subr.bf16.mxu0 %v1598_v55  ;;  %p1886_p8 = scmp.lt.s32.totalorder %s1884_s21, %s1880_s20 }
  0x82   :  { %1285 = vmatprep.subr.bf16.mxu1 %v1600_v56 }
  0x83   :  { %p1887_p9 = por %p1886_p8, %p1885_p7 }
  0x84   :  { %1245 = vmatpush1.bf16.msra.mxu0 %v1597_v61  ;;  %v862_v61 = vld [vmem:[#allocation7 + $0x190] sm:$0xff] }
  0x85   :  { %1286 = vmatpush1.bf16.msra.mxu1 %v1599_v62  ;;  %1246 = vmatprep.subr.bf16.mxu0 %v1590_v63  ;;  %v866_v63 = vld [vmem:[#allocation7 + $0x1b0] sm:$0xff]  ;;  %p1888_p10 = pnand %p1887_p9, %p1881_p6 }
  0x86   :  { %1287 = vmatprep.subr.bf16.mxu1 %v1592_v0  ;;  %v863_v0 = vld [vmem:[#allocation7 + $0x198] sm:$0xff]  ;;  %v1618_v4 = vcombine.high %v862_v61, %v866_v63 }
  0x88   :  { %1247 = vmatpush1.bf16.msra.mxu0 %v1589_v1  ;;  %v867_v1 = vld [vmem:[#allocation7 + $0x1b8] sm:$0xff] }
  0x89   :  { %1288 = vmatpush1.bf16.msra.mxu1 %v1591_v2  ;;  %1248 = vmatprep.subr.bf16.mxu0 %v1582_v6  ;;  %v1620_v5 = vcombine.high %v863_v0, %v867_v1  ;;  %v854_v6 = vld [vmem:[#allocation7 + $0x150] sm:$0xff]  ;;  %v1619_v11 = vcombine.low %v863_v0, %v867_v1 }
  0x8a   :  { %1289 = vmatprep.subr.bf16.mxu1 %v1584_v10  ;;  %v1617_v10 = vcombine.low %v862_v61, %v866_v63  ;;  %v1610_v12 = vcombine.high %v854_v6, %v858_v7 }
  0x8c   :  { %1249 = vmatpush1.bf16.msra.mxu0 %v1581_v8  ;;  %v855_v8 = vld [vmem:[#allocation7 + $0x158] sm:$0xff] }
  0x8d   :  { %1290 = vmatpush1.bf16.msra.mxu1 %v1583_v9  ;;  %1250 = vmatprep.subr.bf16.mxu0 %v1574_v14  ;;  %v859_v9 = vld [vmem:[#allocation7 + $0x178] sm:$0xff]  ;;  %v846_v14 = vld [vmem:[#allocation7 + $0x110] sm:$0xff] }
  0x8e   :  { %1291 = vmatprep.subr.bf16.mxu1 %v1576_v18  ;;  %v1612_v13 = vcombine.high %v855_v8, %v859_v9  ;;  %v1609_v18 = vcombine.low %v854_v6, %v858_v7  ;;  %v1611_v19 = vcombine.low %v855_v8, %v859_v9  ;;  %v1602_v20 = vcombine.high %v846_v14, %v850_v15 }
  0x90   :  { %1251 = vmatpush1.bf16.msra.mxu0 %v1573_v16  ;;  %v847_v16 = vld [vmem:[#allocation7 + $0x118] sm:$0xff] }
  0x91   :  { %1292 = vmatpush1.bf16.msra.mxu1 %v1575_v17  ;;  %1252 = vmatprep.subr.bf16.mxu0 %v1566_v22  ;;  %v851_v17 = vld [vmem:[#allocation7 + $0x138] sm:$0xff]  ;;  %v838_v22 = vld [vmem:[#allocation7 + $0xd0] sm:$0xff] }
  0x92   :  { %1293 = vmatprep.subr.bf16.mxu1 %v1568_v26  ;;  %v1604_v21 = vcombine.high %v847_v16, %v851_v17  ;;  %v1601_v26 = vcombine.low %v846_v14, %v850_v15  ;;  %v1603_v27 = vcombine.low %v847_v16, %v851_v17  ;;  %v1594_v28 = vcombine.high %v838_v22, %v842_v23 }
  0x94   :  { %1253 = vmatpush1.bf16.msra.mxu0 %v1565_v24  ;;  %v839_v24 = vld [vmem:[#allocation7 + $0xd8] sm:$0xff] }
  0x95   :  { %1294 = vmatpush1.bf16.msra.mxu1 %v1567_v25  ;;  %1320 = vmatprep.subr.bf16.mxu0 %v1626_v31  ;;  %v843_v25 = vld [vmem:[#allocation7 + $0xf8] sm:$0xff]  ;;  %v830_v31 = vld [vmem:[#allocation7 + $0x90] sm:$0xff] }
  0x96   :  { %1361 = vmatprep.subr.bf16.mxu1 %v1628_v35  ;;  %v1596_v29 = vcombine.high %v839_v24, %v843_v25  ;;  %v1593_v35 = vcombine.low %v838_v22, %v842_v23 }
 0x117   :  { %v1649_v37 = vpop.f32.mrf.mxu0 }
 0x118   :  { %v1671_v38 = vpop.f32.mrf.mxu1 }
 0x119   :  { %v1650_v39 = vpop.f32.mrf.mxu0 }
 0x11a   :  { %v1672_v40 = vpop.f32.mrf.mxu1  ;;  %v1651_v45 = vadd.f32 %v1650_v39, %v1649_v37  ;;  %v1586_v37 = vcombine.high %v830_v31, %v834_v32  ;;  %v822_v39 = vld [vmem:[#allocation7 + $0x50] sm:$0xff] }
 0x11b   :  { %v1652_v41 = vpop.f32.mrf.mxu0  ;;  %v1673_v48 = vadd.f32 %v1672_v40, %v1671_v38  ;;  %v826_v40 = vld [vmem:[#allocation7 + $0x70] sm:$0xff] }
 0x11c   :  { %v1674_v42 = vpop.f32.mrf.mxu1  ;;  %v684_v47 = vadd.f32 %v1651_v45, %v1500_v46  ;;  %v823_v41 = vld [vmem:[#allocation7 + $0x58] sm:$0xff]  ;;  %v1578_v45 = vcombine.high %v822_v39, %v826_v40 }
 0x11d   :  { %v1653_v43 = vpop.f32.mrf.mxu0  ;;  %v827_v42 = vld [vmem:[#allocation7 + $0x78] sm:$0xff] }
 0x11e   :  { %v1675_v44 = vpop.f32.mrf.mxu1  ;;  %v724_v52 = vadd.f32 %v1673_v48, %v684_v47  ;;  %v1585_v43 = vcombine.low %v830_v31, %v834_v32  ;;  %v1580_v46 = vcombine.high %v823_v41, %v827_v42  ;;  %v814_v47 = vld [vmem:[#allocation7 + $0x10] sm:$0xff] }
 0x11f   :  { %v818_v48 = vld [vmem:[#allocation7 + $0x30] sm:$0xff] }
 0x137   :  { %v1693_v49 = vpop.f32.mrf.mxu0 }
 0x138   :  { %v1715_v50 = vpop.f32.mrf.mxu1 }
 0x139   :  { %v1694_v51 = vpop.f32.mrf.mxu0 }
 0x13a   :  { %v1695_v53 = vadd.f32 %v1694_v51, %v1693_v49  ;;  %v1716_v54 = vpop.f32.mrf.mxu1  ;;  %v815_v49 = vld [vmem:[#allocation7 + $0x18] sm:$0xff]  ;;  %v1577_v51 = vcombine.low %v822_v39, %v826_v40 }
 0x13b   :  { %v1696_v55 = vpop.f32.mrf.mxu0  ;;  %v1717_v57 = vadd.f32 %v1716_v54, %v1715_v50  ;;  %v819_v50 = vld [vmem:[#allocation7 + $0x38] sm:$0xff] }
 0x13c   :  { %v764_v56 = vadd.f32 %v1695_v53, %v724_v52  ;;  %v1718_v58 = vpop.f32.mrf.mxu1  ;;  %v1579_v52 = vcombine.low %v823_v41, %v827_v42  ;;  %v1570_v53 = vcombine.high %v814_v47, %v818_v48  ;;  %v1572_v54 = vcombine.high %v815_v49, %v819_v50 }
 0x13d   :  { %v1697_v59 = vpop.f32.mrf.mxu0  ;;  %v1569_v55 = vcombine.low %v814_v47, %v818_v48 }
 0x13e   :  { %v804_v60 = vadd.f32 %v1717_v57, %v764_v56  ;;  %v1719_v62 = vpop.f32.mrf.mxu1  ;;  %v1571_v56 = vcombine.low %v815_v49, %v819_v50 }
 0x140   :  { %v809_v2 = vmax.f32 %v804_v60, 0.0 }
 0x142   :  { %v2002_v3 = vpack.c.bf16 %v809_v2, %v809_v2 }
 0x144   :  { %811 = vst [vmem:[#allocation10] sm:$0x1] %v2002_v3  ;;  %1271 = vmatmul.mubr.bf16.vlgmr.msra.gmra.mxu0 %v2002_v3  ;;  %1312 = vmatmul.mubr.bf16.vlgmr.msra.gmra.mxu1 %v2002_v3 }
 0x145   :  { %1321 = vmatpush1.bf16.msra.mxu0 %v1625_v33  ;;  %1362 = vmatpush1.bf16.msra.mxu1 %v1627_v34  ;;  %v831_v33 = vld [vmem:[#allocation7 + $0x98] sm:$0xff] }
 0x146   :  { %1322 = vmatprep.subr.bf16.mxu0 %v1618_v4  ;;  %1363 = vmatprep.subr.bf16.mxu1 %v1620_v5  ;;  %v835_v34 = vld [vmem:[#allocation7 + $0xb8] sm:$0xff] }
 0x147   :  { %1352 = vmatprep.mubr.bf16.mxu0 %v1939_v36  ;;  %1393 = vmatprep.mubr.bf16.mxu1 %v1939_v36  ;;  %v1595_v36 = vcombine.low %v839_v24, %v843_v25  ;;  %v1588_v38 = vcombine.high %v831_v33, %v835_v34  ;;  %v1587_v44 = vcombine.low %v831_v33, %v835_v34 }
 0x149   :  { %1323 = vmatpush1.bf16.msra.mxu0 %v1617_v10  ;;  %1364 = vmatpush1.bf16.msra.mxu1 %v1619_v11 }
 0x14a   :  { %1324 = vmatprep.subr.bf16.mxu0 %v1610_v12  ;;  %1365 = vmatprep.subr.bf16.mxu1 %v1612_v13 }
 0x14d   :  { %1325 = vmatpush1.bf16.msra.mxu0 %v1609_v18  ;;  %1366 = vmatpush1.bf16.msra.mxu1 %v1611_v19 }
 0x14e   :  { %1326 = vmatprep.subr.bf16.mxu0 %v1602_v20  ;;  %1367 = vmatprep.subr.bf16.mxu1 %v1604_v21 }
 0x151   :  { %1327 = vmatpush1.bf16.msra.mxu0 %v1601_v26  ;;  %1368 = vmatpush1.bf16.msra.mxu1 %v1603_v27 }
 0x152   :  { %1328 = vmatprep.subr.bf16.mxu0 %v1594_v28  ;;  %1369 = vmatprep.subr.bf16.mxu1 %v1596_v29 }
 0x155   :  { %1329 = vmatpush1.bf16.msra.mxu0 %v1593_v35  ;;  %1370 = vmatpush1.bf16.msra.mxu1 %v1595_v36 }
 0x156   :  { %1330 = vmatprep.subr.bf16.mxu0 %v1586_v37  ;;  %1371 = vmatprep.subr.bf16.mxu1 %v1588_v38 }
 0x159   :  { %1331 = vmatpush1.bf16.msra.mxu0 %v1585_v43  ;;  %1372 = vmatpush1.bf16.msra.mxu1 %v1587_v44 }
 0x15a   :  { %1332 = vmatprep.subr.bf16.mxu0 %v1578_v45  ;;  %1373 = vmatprep.subr.bf16.mxu1 %v1580_v46 }
 0x15d   :  { %1333 = vmatpush1.bf16.msra.mxu0 %v1577_v51  ;;  %1374 = vmatpush1.bf16.msra.mxu1 %v1579_v52 }
 0x15e   :  { %1334 = vmatprep.subr.bf16.mxu0 %v1570_v53  ;;  %1375 = vmatprep.subr.bf16.mxu1 %v1572_v54 }
 0x161   :  { %1335 = vmatpush1.bf16.msra.mxu0 %v1569_v55  ;;  %1376 = vmatpush1.bf16.msra.mxu1 %v1571_v56 }
 0x164   :  { %1353 = vmatmul.mubr.bf16.vlgmr.msra.gmra.mxu0 %v2002_v3  ;;  %1394 = vmatmul.mubr.bf16.vlgmr.msra.gmra.mxu1 %v2002_v3 }
 0x165   :  { %1891 = shalt.err (!%p1888_p10)
}
 0x166   :  { %1478 = dma.vmem_to_hbm [thread:$0]  %s1476_s19, 16, %s2029_s5, [#allocation4]   ;;  %v884_v1 = vsub.s32 1, %v1990_v30  ;;  %v892_v2 = vsub.s32 3, %v1990_v30  ;;  %v880_v3 = vsub.s32 0, %v1990_v30  ;;  %v888_v4 = vsub.s32 2, %v1990_v30 }
 0x167   :  { %v876_v5 = vld [vmem:[#allocation8] sm:$0xff]  ;;  %v1941_v7 = vmov 1966171168   ;;  %v896_v15 = vsub.s32 4, %v1990_v30  ;;  %v904_v16 = vsub.s32 6, %v1990_v30  ;;  %v900_v17 = vsub.s32 5, %v1990_v30 }
 0x168   :  { %v885_v6 = vrot.slane %v876_v5, %v884_v1  ;;  %v1423_v8 = vunpack.c.l.s4 %v1941_v7  ;;  %v893_v9 = vrot.slane %v876_v5, %v892_v2  ;;  %v881_v10 = vrot.slane %v876_v5, %v880_v3  ;;  %s1942_s5 = smov [#allocation11]  }
 0x169   :  { %v889_v11 = vrot.slane %v876_v5, %v888_v4  ;;  %v908_v18 = vsub.s32 7, %v1990_v30  ;;  %v897_v24 = vrot.slane %v876_v5, %v896_v15  ;;  %v905_v25 = vrot.slane %v876_v5, %v904_v16  ;;  %s1485_s24 = sshll.u32 %s1942_s5, 4  ;;  %s1486_s24 = int_to_ptr.vmem [resolvable:$true] %s1485_s24 }
 0x16a   :  { %v1424_v13 = vunpack.c.0.s8 %v1423_v8  ;;  %v901_v26 = vrot.slane %v876_v5, %v900_v17  ;;  %s1900_s25 = scalar_lea.vmem %s1486_s24, 128  ;;  %p1905_p12 = scmp.lt.s32.totalorder %s1486_s24, %s1486_s24 }
 0x16b   :  { %v909_v27 = vrot.slane %v876_v5, %v908_v18  ;;  %p1901_p11 = scmp.ne.s32.totalorder %s1486_s24, %s1900_s25  ;;  %p1906_p13 = scmp.lt.s32.totalorder %s1900_s25, %s1900_s25 }
 0x16c   :  { %v1427_v22 = vsub.s32 %v1424_v13, %v1990_v30 }
 0x16d   :  { %p1907_p0 = por %p1906_p13, %p1905_p12 }
 0x16f   :  { %p1908_p1 = pnand %p1907_p0, %p1901_p11 }
 0x204   :  { %v1272_v57 = vpop.f32.mrf.mxu0  ;;  %v1313_v58 = vpop.f32.mrf.mxu1 }
 0x205   :  { %v1273_v19 = vadd.f32 %v1272_v57, %v881_v10  ;;  %v1314_v20 = vadd.f32 %v1313_v58, %v889_v11 }
 0x206   :  { %v1274_v59 = vpop.f32.mrf.mxu0  ;;  %v1315_v60 = vpop.f32.mrf.mxu1 }
 0x207   :  { %v1275_v12 = vadd.f32 %v1274_v59, %v885_v6  ;;  %v1316_v14 = vadd.f32 %v1315_v60, %v893_v9 }
 0x208   :  { %v1276_v61 = vpop.f32.mrf.mxu0  ;;  %v1317_v62 = vpop.f32.mrf.mxu1 }
 0x209   :  { %v1629_v21 = vpack.c.bf16 %v1275_v12, %v1273_v19  ;;  %v1630_v23 = vpack.c.bf16 %v1316_v14, %v1314_v20 }
 0x20a   :  { %v1277_v63 = vpop.f32.mrf.mxu0  ;;  %v1318_v0 = vpop.f32.mrf.mxu1 }
 0x20b   :  { %v1428_v31 = vrot.slane %v1629_v21, %v1427_v22  ;;  %v1435_v32 = vrot.slane %v1630_v23, %v1427_v22 }
 0x20d   :  { %v1450_v44 = vcombine.low %v1428_v31, %v1435_v32 }
 0x20f   :  { %v1458_v48 = vrot.slane %v1450_v44, %v1427_v22 }
 0x224   :  { %v1354_v28 = vpop.f32.mrf.mxu0  ;;  %v1395_v29 = vpop.f32.mrf.mxu1 }
 0x225   :  { %v1355_v35 = vadd.f32 %v1354_v28, %v897_v24  ;;  %v1396_v36 = vadd.f32 %v1395_v29, %v905_v25 }
 0x226   :  { %v1356_v33 = vpop.f32.mrf.mxu0  ;;  %v1397_v34 = vpop.f32.mrf.mxu1 }
 0x227   :  { %v1357_v37 = vadd.f32 %v1356_v33, %v901_v26  ;;  %v1398_v38 = vadd.f32 %v1397_v34, %v909_v27 }
 0x228   :  { %v1358_v39 = vpop.f32.mrf.mxu0  ;;  %v1399_v40 = vpop.f32.mrf.mxu1 }
 0x229   :  { %v1631_v41 = vpack.c.bf16 %v1357_v37, %v1355_v35  ;;  %v1632_v42 = vpack.c.bf16 %v1398_v38, %v1396_v36 }
 0x22a   :  { %v1359_v30 = vpop.f32.mrf.mxu0  ;;  %v1400_v43 = vpop.f32.mrf.mxu1 }
 0x22b   :  { %v1442_v45 = vrot.slane %v1631_v41, %v1427_v22  ;;  %v1449_v46 = vrot.slane %v1632_v42, %v1427_v22 }
 0x22d   :  { %v1451_v47 = vcombine.low %v1442_v45, %v1449_v46 }
 0x22f   :  { %v1465_v49 = vrot.slane %v1451_v47, %v1427_v22 }
 0x231   :  { %v1466_v50 = vcombine.low %v1458_v48, %v1465_v49 }
 0x233   :  { %1468 = vst [vmem:[#allocation11] sm:$0xff] %v1466_v50 }
 0x234   :  { %1911 = shalt.err (!%p1908_p1)
}
 0x235   :  { %1488 = dma.vmem_to_hbm [thread:$0]  %s1486_s24, 128, %s2030_s6, [#allocation12]  }
 0x236   :  { %1926 = dma.done.wait [#allocation4], 16  }
 0x237   :  { %1927 = vsyncadd [#allocation4], 4294967280 }
 0x238   :  { %1928 = dma.done.wait [#allocation12], 128  }
 0x239   :  { %1929 = vsyncadd [#allocation12], 4294967168 }
 0x23a   :  { %1495 = vsyncpa [#allocation3], 1 }
 0x23b   :  { %1496 = vsyncpa [#allocation6], 1 }
 0x23c   :  { %1497 = vsyncpa [#allocation9], 1 }
 0x23d   :  { %1498 = vsyncpa [#allocation4], 1 }
 0x23e   :  { %1499 = vsyncpa [#allocation12], 1 }

</bundles_post_ra>
